<compile_context>
chip_gen: v5e
topology: v5e:2x2
jax: 0.10.0
libtpu: 0.0.40
codegen_flags: <defaults>
</compile_context>

<pallas_src>
import math

import jax
import jax.numpy as jnp
from jax import lax
from jax.experimental import pallas as pl
from jax.experimental.pallas import tpu as pltpu


# ---------------------------------------------------------------------------
# shared numerics
# ---------------------------------------------------------------------------
def _layernorm(x, g, b, eps=1e-5):
    mu = jnp.mean(x, axis=-1, keepdims=True)
    xc = x - mu
    var = jnp.mean(xc * xc, axis=-1, keepdims=True)
    return xc * lax.rsqrt(var + eps) * g + b


def _gelu_tanh(x):
    # TODO(synk): PyTorch nn.GELU defaults to the exact erf formulation; the
    # tanh approximation is used here (erf has no guaranteed Mosaic lowering).
    c = math.sqrt(2.0 / math.pi)
    return 0.5 * x * (1.0 + jnp.tanh(c * (x + 0.044715 * x * x * x)))


def sinusoidal_pos_embedding(words, dim):
    position = jnp.arange(words + 1, dtype=jnp.float32)[:, None]
    div_term = jnp.exp(
        jnp.arange(0, dim, 2, dtype=jnp.float32) * (-math.log(10000.0) / dim))
    ang = position * div_term                                 # (words+1, dim//2)
    # interleave [sin0, cos0, sin1, cos1, ...] == pe[:,0::2]=sin, pe[:,1::2]=cos
    return jnp.stack([jnp.sin(ang), jnp.cos(ang)], axis=-1).reshape(words + 1, dim)


# ---------------------------------------------------------------------------
# Pallas kernel
# ---------------------------------------------------------------------------
def _make_kernel(n, n1, dim, heads, dim_head, inner, mlp_dim, scale):
    def kernel(x_ref, cls_ref, pos_ref,
               ln1g_ref, ln1b_ref, wqkv_ref, wout_ref, bout_ref,
               ln2g_ref, ln2b_ref, w1_ref, b1_ref, w2_ref, b2_ref,
               o_ref):
        l = pl.program_id(1)

        # ----- layer 0: build (cls ++ tokens) + positional embedding ---------
        @pl.when(l == 0)
        def _init():
            pos = pos_ref[...]                          # (n1, dim)
            cls_row = cls_ref[...] + pos[0:1, :]        # (1, dim)
            toks = x_ref[0] + pos[1:, :]                # (n, dim)
            o_ref[0] = jnp.concatenate([cls_row, toks], axis=0)

        x = o_ref[0]                                    # residual stream (n1, dim)

        # ----- attention block: x + to_out(softmax(q k^T * scale) v) ---------
        y = _layernorm(x, ln1g_ref[0], ln1b_ref[0])
        qkv = jnp.dot(y, wqkv_ref[0], preferred_element_type=jnp.float32)  # (n1, 3*inner)

        head_outs = []
        for h in range(heads):
            q = qkv[:, h * dim_head:(h + 1) * dim_head]
            k = qkv[:, inner + h * dim_head: inner + (h + 1) * dim_head]
            v = qkv[:, 2 * inner + h * dim_head: 2 * inner + (h + 1) * dim_head]
            dots = lax.dot_general(q, k, (((1,), (1,)), ((), ())),
                                   preferred_element_type=jnp.float32) * scale
            dots = dots - jnp.max(dots, axis=-1, keepdims=True)
            p = jnp.exp(dots)
            p = p / jnp.sum(p, axis=-1, keepdims=True)
            head_outs.append(
                jnp.dot(p, v, preferred_element_type=jnp.float32))
        attn_out = jnp.concatenate(head_outs, axis=-1)                      # (n1, inner)

        proj = jnp.dot(attn_out, wout_ref[0],
                       preferred_element_type=jnp.float32) + bout_ref[0]
        x = x + proj

        # ----- feed-forward block: x + W2 gelu(W1 LN(x) + b1) + b2 -----------
        y = _layernorm(x, ln2g_ref[0], ln2b_ref[0])
        hdn = jnp.dot(y, w1_ref[0], preferred_element_type=jnp.float32) + b1_ref[0]
        hdn = _gelu_tanh(hdn)
        ff = jnp.dot(hdn, w2_ref[0], preferred_element_type=jnp.float32) + b2_ref[0]
        x = x + ff

        o_ref[0] = x

    return kernel


def txt_transformer_forward(x, cls_token, pos_emb, stacked, heads, dim_head):
    """x: (b, n, dim) f32.  stacked: per-layer params stacked along depth axis.

    Returns (b, n+1, dim) — cls token prepended, then `depth` transformer layers.
    """
    b, n, dim = x.shape
    n1 = n + 1
    depth = stacked["wqkv_t"].shape[0]
    inner = heads * dim_head
    mlp_dim = stacked["w1_t"].shape[-1]
    scale = dim_head ** -0.5

    kernel = _make_kernel(n, n1, dim, heads, dim_head, inner, mlp_dim, scale)

    def vec_spec(last):       # (depth, 1, last) stacked bias / LN param
        return pl.BlockSpec((1, 1, last), lambda i, l: (l, 0, 0))

    def mat_spec(r, c):       # (depth, r, c) stacked weight matrix
        return pl.BlockSpec((1, r, c), lambda i, l: (l, 0, 0))

    # advisory cost hint for XLA scheduling around the custom call
    flops = int(b * depth * (2 * n1 * dim * 3 * inner + 4 * n1 * n1 * inner
                             + 2 * n1 * inner * dim + 4 * n1 * dim * mlp_dim))
    transcendentals = int(b * depth * (heads * n1 * n1 + n1 * mlp_dim + 4 * n1))
    bytes_accessed = int(4 * (b * n * dim + b * n1 * dim + n1 * dim + dim
                              + b * depth * (dim * 3 * inner + inner * dim
                                             + 2 * dim * mlp_dim
                                             + 6 * dim + mlp_dim)))

    out = pl.pallas_call(
        kernel,
        out_shape=jax.ShapeDtypeStruct((b, n1, dim), jnp.float32),
        grid_spec=pltpu.PrefetchScalarGridSpec(
            num_scalar_prefetch=0,
            grid=(b, depth),
            in_specs=[
                pl.BlockSpec((1, n, dim), lambda i, l: (i, 0, 0)),   # x tokens
                pl.BlockSpec((1, dim), lambda i, l: (0, 0)),          # cls token
                pl.BlockSpec((n1, dim), lambda i, l: (0, 0)),         # pos emb
                vec_spec(dim),                 # ln1 gamma
                vec_spec(dim),                 # ln1 beta
                mat_spec(dim, 3 * inner),      # Wqkv^T
                mat_spec(inner, dim),          # Wout^T
                vec_spec(dim),                 # b_out
                vec_spec(dim),                 # ln2 gamma
                vec_spec(dim),                 # ln2 beta
                mat_spec(dim, mlp_dim),        # W1^T
                vec_spec(mlp_dim),             # b1
                mat_spec(mlp_dim, dim),        # W2^T
                vec_spec(dim),                 # b2
            ],
            out_specs=pl.BlockSpec((1, n1, dim), lambda i, l: (i, 0, 0)),
        ),
        compiler_params=pltpu.CompilerParams(
            dimension_semantics=("parallel", "arbitrary"),
            vmem_limit_bytes=32 * 1024 * 1024,   # safe on v5e/v6e/v7x
        ),
        cost_estimate=pl.CostEstimate(
            flops=flops, transcendentals=transcendentals,
            bytes_accessed=bytes_accessed),
    )(x.astype(jnp.float32),
      cls_token.reshape(1, dim).astype(jnp.float32),
      pos_emb.astype(jnp.float32),
      stacked["ln1_g"], stacked["ln1_b"],
      stacked["wqkv_t"], stacked["wout_t"], stacked["bout"],
      stacked["ln2_g"], stacked["ln2_b"],
      stacked["w1_t"], stacked["b1"],
      stacked["w2_t"], stacked["b2"])
    return out


# ---------------------------------------------------------------------------
# Pure-JAX reference (mirrors the PyTorch forward in eval mode)
# ---------------------------------------------------------------------------
def txt_transformer_reference(x, cls_token, pos_emb, layers, heads, dim_head):
    b, n, dim = x.shape
    inner = heads * dim_head
    scale = dim_head ** -0.5
    hp = lax.Precision.HIGHEST

    z = jnp.concatenate(
        [jnp.broadcast_to(cls_token.reshape(1, 1, dim), (b, 1, dim)), x], axis=1)
    z = z + pos_emb[None]

    for p in layers:
        # --- PreNorm(Attention) + residual ---
        y = _layernorm(z, p["ln1_g"], p["ln1_b"])
        qkv = jnp.einsum("bnd,ed->bne", y, p["wqkv"], precision=hp)
        q, k, v = jnp.split(qkv, 3, axis=-1)

        def to_heads(t):
            return t.reshape(b, n + 1, heads, dim_head).transpose(0, 2, 1, 3)

        q, k, v = to_heads(q), to_heads(k), to_heads(v)
        dots = jnp.einsum("bhid,bhjd->bhij", q, k, precision=hp) * scale
        attn = jax.nn.softmax(dots, axis=-1)
        o = jnp.einsum("bhij,bhjd->bhid", attn, v, precision=hp)
        o = o.transpose(0, 2, 1, 3).reshape(b, n + 1, inner)
        o = jnp.einsum("bne,de->bnd", o, p["wout"], precision=hp) + p["bout"]
        z = z + o

        # --- PreNorm(FeedForward) + residual ---
        y = _layernorm(z, p["ln2_g"], p["ln2_b"])
        h1 = _gelu_tanh(jnp.einsum("bnd,md->bnm", y, p["w1"], precision=hp) + p["b1"])
        h2 = jnp.einsum("bnm,dm->bnd", h1, p["w2"], precision=hp) + p["b2"]
        z = z + h2
    return z


# ---------------------------------------------------------------------------
# self-test
# ---------------------------------------------------------------------------
if __name__ == "__main__":
    key = jax.random.PRNGKey(0)
    words, dim, depth, heads, dim_head, mlp_dim = 8, 32, 2, 4, 8, 64
    batch = 2
    inner = heads * dim_head
    assert dim % 2 == 0

    keys = jax.random.split(key, 2 + depth)
    x = jax.random.normal(keys[0], (batch, words, dim), jnp.float32)
    cls_token = jax.random.normal(keys[1], (1, 1, dim), jnp.float32)
    pos_emb = sinusoidal_pos_embedding(words, dim)

    layers = []
    for li in range(depth):
        lk = jax.random.split(keys[2 + li], 11)
        layers.append(dict(
            ln1_g=jax.random.uniform(lk[0], (dim,), jnp.float32, 0.5, 1.5),
            ln1_b=jax.random.normal(lk[1], (dim,), jnp.float32) * 0.1,
            wqkv=jax.random.normal(lk[2], (3 * inner, dim), jnp.float32) / math.sqrt(dim),
            wout=jax.random.normal(lk[3], (dim, inner), jnp.float32) / math.sqrt(inner),
            bout=jax.random.normal(lk[4], (dim,), jnp.float32) * 0.1,
            ln2_g=jax.random.uniform(lk[5], (dim,), jnp.float32, 0.5, 1.5),
            ln2_b=jax.random.normal(lk[6], (dim,), jnp.float32) * 0.1,
            w1=jax.random.normal(lk[7], (mlp_dim, dim), jnp.float32) / math.sqrt(dim),
            b1=jax.random.normal(lk[8], (mlp_dim,), jnp.float32) * 0.1,
            w2=jax.random.normal(lk[9], (dim, mlp_dim), jnp.float32) / math.sqrt(mlp_dim),
            b2=jax.random.normal(lk[10], (dim,), jnp.float32) * 0.1,
        ))

    # stack per-layer params along a depth axis, pre-transposed for x @ W^T
    stacked = dict(
        ln1_g=jnp.stack([p["ln1_g"] for p in layers]).reshape(depth, 1, dim),
        ln1_b=jnp.stack([p["ln1_b"] for p in layers]).reshape(depth, 1, dim),
        wqkv_t=jnp.stack([p["wqkv"].T for p in layers]),           # (depth, dim, 3*inner)
        wout_t=jnp.stack([p["wout"].T for p in layers]),           # (depth, inner, dim)
        bout=jnp.stack([p["bout"] for p in layers]).reshape(depth, 1, dim),
        ln2_g=jnp.stack([p["ln2_g"] for p in layers]).reshape(depth, 1, dim),
        ln2_b=jnp.stack([p["ln2_b"] for p in layers]).reshape(depth, 1, dim),
        w1_t=jnp.stack([p["w1"].T for p in layers]),               # (depth, dim, mlp)
        b1=jnp.stack([p["b1"] for p in layers]).reshape(depth, 1, mlp_dim),
        w2_t=jnp.stack([p["w2"].T for p in layers]),               # (depth, mlp, dim)
        b2=jnp.stack([p["b2"] for p in layers]).reshape(depth, 1, dim),
    )

    out = txt_transformer_forward(x, cls_token, pos_emb, stacked, heads, dim_head)
    out = jax.block_until_ready(out)

    ref = txt_transformer_reference(x, cls_token, pos_emb, layers, heads, dim_head)

    assert out.shape == (batch, words + 1, dim)
    assert jnp.allclose(out, ref, rtol=2e-3, atol=2e-3), (
        "mismatch vs reference, max abs diff %g" % float(jnp.max(jnp.abs(out - ref))))

    print("KERNEL_OK")
</pallas_src>

<mosaic_0001>
module attributes {stable_mosaic.version = 11 : i64} {
  func.func @kernel(%arg0: i32, %arg1: i32, %arg2: memref<1x8x32xf32, #tpu.memory_space<vmem>>, %arg3: memref<1x32xf32, #tpu.memory_space<vmem>>, %arg4: memref<9x32xf32, #tpu.memory_space<vmem>>, %arg5: memref<1x1x32xf32, #tpu.memory_space<vmem>>, %arg6: memref<1x1x32xf32, #tpu.memory_space<vmem>>, %arg7: memref<1x32x96xf32, #tpu.memory_space<vmem>>, %arg8: memref<1x32x32xf32, #tpu.memory_space<vmem>>, %arg9: memref<1x1x32xf32, #tpu.memory_space<vmem>>, %arg10: memref<1x1x32xf32, #tpu.memory_space<vmem>>, %arg11: memref<1x1x32xf32, #tpu.memory_space<vmem>>, %arg12: memref<1x32x64xf32, #tpu.memory_space<vmem>>, %arg13: memref<1x1x64xf32, #tpu.memory_space<vmem>>, %arg14: memref<1x64x32xf32, #tpu.memory_space<vmem>>, %arg15: memref<1x1x32xf32, #tpu.memory_space<vmem>>, %arg16: memref<1x9x32xf32, #tpu.memory_space<vmem>>) attributes {dimension_semantics = [#tpu.dimension_semantics<parallel>, #tpu.dimension_semantics<arbitrary>], iteration_bounds = array<i64: 2, 2>, scalar_prefetch = 0 : i64, scratch_operands = 0 : i64, tpu.core_type = #tpu.core_type<tc>, window_params = [{transform_indices = @transform_0, window_bounds = array<i64: 1, 8, 32>}, {pipeline_mode = #tpu.pipeline_mode<synchronous>, transform_indices = @transform_1, window_bounds = array<i64: 1, 32>}, {pipeline_mode = #tpu.pipeline_mode<synchronous>, transform_indices = @transform_2, window_bounds = array<i64: 9, 32>}, {transform_indices = @transform_3, window_bounds = array<i64: 1, 1, 32>}, {transform_indices = @transform_4, window_bounds = array<i64: 1, 1, 32>}, {transform_indices = @transform_5, window_bounds = array<i64: 1, 32, 96>}, {transform_indices = @transform_6, window_bounds = array<i64: 1, 32, 32>}, {transform_indices = @transform_7, window_bounds = array<i64: 1, 1, 32>}, {transform_indices = @transform_8, window_bounds = array<i64: 1, 1, 32>}, {transform_indices = @transform_9, window_bounds = array<i64: 1, 1, 32>}, {transform_indices = @transform_10, window_bounds = array<i64: 1, 32, 64>}, {transform_indices = @transform_11, window_bounds = array<i64: 1, 1, 64>}, {transform_indices = @transform_12, window_bounds = array<i64: 1, 64, 32>}, {transform_indices = @transform_13, window_bounds = array<i64: 1, 1, 32>}, {transform_indices = @transform_14, window_bounds = array<i64: 1, 9, 32>}]} {
    %c0_i32 = arith.constant 0 : i32
    %0 = arith.cmpi eq, %arg1, %c0_i32 : i32
    %1 = arith.extui %0 : i1 to i32
    %c0_i32_0 = arith.constant 0 : i32
    %2 = arith.cmpi ne, %1, %c0_i32_0 : i32
    scf.if %2 {
      %c0_76 = arith.constant 0 : index
      %c0_77 = arith.constant 0 : index
      %160 = vector.load %arg4[%c0_76, %c0_77] : memref<9x32xf32, #tpu.memory_space<vmem>>, vector<9x32xf32>
      %c0_78 = arith.constant 0 : index
      %c0_79 = arith.constant 0 : index
      %161 = vector.load %arg3[%c0_78, %c0_79] : memref<1x32xf32, #tpu.memory_space<vmem>>, vector<1x32xf32>
      %162 = vector.extract_strided_slice %160 {offsets = [0, 0], sizes = [1, 32], strides = [1, 1]} : vector<9x32xf32> to vector<1x32xf32>
      %163 = arith.addf %161, %162 : vector<1x32xf32>
      %c0_80 = arith.constant 0 : index
      %c0_81 = arith.constant 0 : index
      %c0_82 = arith.constant 0 : index
      %164 = vector.load %arg2[%c0_80, %c0_81, %c0_82] : memref<1x8x32xf32, #tpu.memory_space<vmem>>, vector<1x8x32xf32>
      %165 = vector.shape_cast %164 : vector<1x8x32xf32> to vector<8x32xf32>
      %166 = vector.extract_strided_slice %160 {offsets = [1, 0], sizes = [8, 32], strides = [1, 1]} : vector<9x32xf32> to vector<8x32xf32>
      %167 = arith.addf %165, %166 : vector<8x32xf32>
      %168 = tpu.concatenate %163, %167 in 0 : vector<1x32xf32>, vector<8x32xf32> -> vector<9x32xf32>
      %c0_83 = arith.constant 0 : index
      %c0_84 = arith.constant 0 : index
      %c0_85 = arith.constant 0 : index
      %169 = vector.load %arg16[%c0_83, %c0_84, %c0_85] : memref<1x9x32xf32, #tpu.memory_space<vmem>>, vector<1x9x32xf32>
      %170 = vector.shape_cast %169 : vector<1x9x32xf32> to vector<9x32xf32>
      %171 = vector.shape_cast %168 : vector<9x32xf32> to vector<1x9x32xf32>
      tpu.vector_store %arg16[%c0_83, %c0_84, %c0_85], %171 {strides = array<i32>} : memref<1x9x32xf32, #tpu.memory_space<vmem>>, vector<1x9x32xf32>,
    } else {
    }
    %c0 = arith.constant 0 : index
    %c0_1 = arith.constant 0 : index
    %c0_2 = arith.constant 0 : index
    %3 = vector.load %arg16[%c0, %c0_1, %c0_2] : memref<1x9x32xf32, #tpu.memory_space<vmem>>, vector<1x9x32xf32>
    %4 = vector.shape_cast %3 : vector<1x9x32xf32> to vector<9x32xf32>
    %c0_3 = arith.constant 0 : index
    %c0_4 = arith.constant 0 : index
    %c0_5 = arith.constant 0 : index
    %5 = vector.load %arg5[%c0_3, %c0_4, %c0_5] : memref<1x1x32xf32, #tpu.memory_space<vmem>>, vector<1x1x32xf32>
    %6 = vector.shape_cast %5 : vector<1x1x32xf32> to vector<1x32xf32>
    %c0_6 = arith.constant 0 : index
    %c0_7 = arith.constant 0 : index
    %c0_8 = arith.constant 0 : index
    %7 = vector.load %arg6[%c0_6, %c0_7, %c0_8] : memref<1x1x32xf32, #tpu.memory_space<vmem>>, vector<1x1x32xf32>
    %8 = vector.shape_cast %7 : vector<1x1x32xf32> to vector<1x32xf32>
    %cst = arith.constant dense<0.000000e+00> : vector<9xf32>
    %9 = vector.multi_reduction <add>, %4, %cst [1] : vector<9x32xf32> to vector<9xf32>
    %10 = vector.shape_cast %9 : vector<9xf32> to vector<9x1xf32>
    %cst_9 = arith.constant 3.200000e+01 : f32
    %11 = vector.broadcast %cst_9 : f32 to vector<9x1xf32>
    %12 = arith.divf %10, %11 : vector<9x1xf32>
    %13 = vector.broadcast %12 : vector<9x1xf32> to vector<9x32xf32>
    %14 = arith.subf %4, %13 : vector<9x32xf32>
    %15 = arith.mulf %14, %14 : vector<9x32xf32>
    %cst_10 = arith.constant dense<0.000000e+00> : vector<9xf32>
    %16 = vector.multi_reduction <add>, %15, %cst_10 [1] : vector<9x32xf32> to vector<9xf32>
    %17 = vector.shape_cast %16 : vector<9xf32> to vector<9x1xf32>
    %cst_11 = arith.constant 3.200000e+01 : f32
    %18 = vector.broadcast %cst_11 : f32 to vector<9x1xf32>
    %19 = arith.divf %17, %18 : vector<9x1xf32>
    %cst_12 = arith.constant 9.99999974E-6 : f32
    %20 = vector.broadcast %cst_12 : f32 to vector<9x1xf32>
    %21 = arith.addf %19, %20 : vector<9x1xf32>
    %22 = math.rsqrt %21 : vector<9x1xf32>
    %23 = vector.broadcast %22 : vector<9x1xf32> to vector<9x32xf32>
    %24 = arith.mulf %14, %23 : vector<9x32xf32>
    %25 = vector.broadcast %6 : vector<1x32xf32> to vector<9x32xf32>
    %26 = arith.mulf %24, %25 : vector<9x32xf32>
    %27 = vector.broadcast %8 : vector<1x32xf32> to vector<9x32xf32>
    %28 = arith.addf %26, %27 : vector<9x32xf32>
    %c0_13 = arith.constant 0 : index
    %c0_14 = arith.constant 0 : index
    %c0_15 = arith.constant 0 : index
    %29 = vector.load %arg7[%c0_13, %c0_14, %c0_15] : memref<1x32x96xf32, #tpu.memory_space<vmem>>, vector<1x32x96xf32>
    %30 = vector.shape_cast %29 : vector<1x32x96xf32> to vector<32x96xf32>
    %cst_16 = arith.constant dense<0.000000e+00> : vector<9x96xf32>
    %31 = tpu.matmul %28, %30, %cst_16 {dimension_numbers = #tpu.dot_dimension_numbers<[1], [0], [0], [1], [0, 0, 1, 1], [], []>} : vector<9x32xf32>, vector<32x96xf32>, vector<9x96xf32> -> vector<9x96xf32>
    %32 = vector.extract_strided_slice %31 {offsets = [0, 0], sizes = [9, 8], strides = [1, 1]} : vector<9x96xf32> to vector<9x8xf32>
    %33 = vector.extract_strided_slice %31 {offsets = [0, 32], sizes = [9, 8], strides = [1, 1]} : vector<9x96xf32> to vector<9x8xf32>
    %34 = vector.extract_strided_slice %31 {offsets = [0, 64], sizes = [9, 8], strides = [1, 1]} : vector<9x96xf32> to vector<9x8xf32>
    %cst_17 = arith.constant dense<0.000000e+00> : vector<9x9xf32>
    %35 = tpu.matmul %32, %33, %cst_17 {dimension_numbers = #tpu.dot_dimension_numbers<[1], [1], [0], [0], [0, 0, 1, 0], [], []>} : vector<9x8xf32>, vector<9x8xf32>, vector<9x9xf32> -> vector<9x9xf32>
    %cst_18 = arith.constant 0.353553385 : f32
    %36 = vector.broadcast %cst_18 : f32 to vector<9x9xf32>
    %37 = arith.mulf %35, %36 : vector<9x9xf32>
    %cst_19 = arith.constant dense<0xFF800000> : vector<9xf32>
    %38 = vector.multi_reduction <maximumf>, %37, %cst_19 [1] : vector<9x9xf32> to vector<9xf32>
    %39 = vector.shape_cast %38 : vector<9xf32> to vector<9x1xf32>
    %40 = vector.broadcast %39 : vector<9x1xf32> to vector<9x9xf32>
    %41 = arith.subf %37, %40 : vector<9x9xf32>
    %42 = math.exp %41 : vector<9x9xf32>
    %cst_20 = arith.constant dense<0.000000e+00> : vector<9xf32>
    %43 = vector.multi_reduction <add>, %42, %cst_20 [1] : vector<9x9xf32> to vector<9xf32>
    %44 = vector.shape_cast %43 : vector<9xf32> to vector<9x1xf32>
    %45 = vector.broadcast %44 : vector<9x1xf32> to vector<9x9xf32>
    %46 = arith.divf %42, %45 : vector<9x9xf32>
    %cst_21 = arith.constant dense<0.000000e+00> : vector<9x8xf32>
    %47 = tpu.matmul %46, %34, %cst_21 {dimension_numbers = #tpu.dot_dimension_numbers<[1], [0], [0], [1], [0, 0, 1, 1], [], []>} : vector<9x9xf32>, vector<9x8xf32>, vector<9x8xf32> -> vector<9x8xf32>
    %48 = vector.extract_strided_slice %31 {offsets = [0, 8], sizes = [9, 8], strides = [1, 1]} : vector<9x96xf32> to vector<9x8xf32>
    %49 = vector.extract_strided_slice %31 {offsets = [0, 40], sizes = [9, 8], strides = [1, 1]} : vector<9x96xf32> to vector<9x8xf32>
    %50 = vector.extract_strided_slice %31 {offsets = [0, 72], sizes = [9, 8], strides = [1, 1]} : vector<9x96xf32> to vector<9x8xf32>
    %cst_22 = arith.constant dense<0.000000e+00> : vector<9x9xf32>
    %51 = tpu.matmul %48, %49, %cst_22 {dimension_numbers = #tpu.dot_dimension_numbers<[1], [1], [0], [0], [0, 0, 1, 0], [], []>} : vector<9x8xf32>, vector<9x8xf32>, vector<9x9xf32> -> vector<9x9xf32>
    %cst_23 = arith.constant 0.353553385 : f32
    %52 = vector.broadcast %cst_23 : f32 to vector<9x9xf32>
    %53 = arith.mulf %51, %52 : vector<9x9xf32>
    %cst_24 = arith.constant dense<0xFF800000> : vector<9xf32>
    %54 = vector.multi_reduction <maximumf>, %53, %cst_24 [1] : vector<9x9xf32> to vector<9xf32>
    %55 = vector.shape_cast %54 : vector<9xf32> to vector<9x1xf32>
    %56 = vector.broadcast %55 : vector<9x1xf32> to vector<9x9xf32>
    %57 = arith.subf %53, %56 : vector<9x9xf32>
    %58 = math.exp %57 : vector<9x9xf32>
    %cst_25 = arith.constant dense<0.000000e+00> : vector<9xf32>
    %59 = vector.multi_reduction <add>, %58, %cst_25 [1] : vector<9x9xf32> to vector<9xf32>
    %60 = vector.shape_cast %59 : vector<9xf32> to vector<9x1xf32>
    %61 = vector.broadcast %60 : vector<9x1xf32> to vector<9x9xf32>
    %62 = arith.divf %58, %61 : vector<9x9xf32>
    %cst_26 = arith.constant dense<0.000000e+00> : vector<9x8xf32>
    %63 = tpu.matmul %62, %50, %cst_26 {dimension_numbers = #tpu.dot_dimension_numbers<[1], [0], [0], [1], [0, 0, 1, 1], [], []>} : vector<9x9xf32>, vector<9x8xf32>, vector<9x8xf32> -> vector<9x8xf32>
    %64 = vector.extract_strided_slice %31 {offsets = [0, 16], sizes = [9, 8], strides = [1, 1]} : vector<9x96xf32> to vector<9x8xf32>
    %65 = vector.extract_strided_slice %31 {offsets = [0, 48], sizes = [9, 8], strides = [1, 1]} : vector<9x96xf32> to vector<9x8xf32>
    %66 = vector.extract_strided_slice %31 {offsets = [0, 80], sizes = [9, 8], strides = [1, 1]} : vector<9x96xf32> to vector<9x8xf32>
    %cst_27 = arith.constant dense<0.000000e+00> : vector<9x9xf32>
    %67 = tpu.matmul %64, %65, %cst_27 {dimension_numbers = #tpu.dot_dimension_numbers<[1], [1], [0], [0], [0, 0, 1, 0], [], []>} : vector<9x8xf32>, vector<9x8xf32>, vector<9x9xf32> -> vector<9x9xf32>
    %cst_28 = arith.constant 0.353553385 : f32
    %68 = vector.broadcast %cst_28 : f32 to vector<9x9xf32>
    %69 = arith.mulf %67, %68 : vector<9x9xf32>
    %cst_29 = arith.constant dense<0xFF800000> : vector<9xf32>
    %70 = vector.multi_reduction <maximumf>, %69, %cst_29 [1] : vector<9x9xf32> to vector<9xf32>
    %71 = vector.shape_cast %70 : vector<9xf32> to vector<9x1xf32>
    %72 = vector.broadcast %71 : vector<9x1xf32> to vector<9x9xf32>
    %73 = arith.subf %69, %72 : vector<9x9xf32>
    %74 = math.exp %73 : vector<9x9xf32>
    %cst_30 = arith.constant dense<0.000000e+00> : vector<9xf32>
    %75 = vector.multi_reduction <add>, %74, %cst_30 [1] : vector<9x9xf32> to vector<9xf32>
    %76 = vector.shape_cast %75 : vector<9xf32> to vector<9x1xf32>
    %77 = vector.broadcast %76 : vector<9x1xf32> to vector<9x9xf32>
    %78 = arith.divf %74, %77 : vector<9x9xf32>
    %cst_31 = arith.constant dense<0.000000e+00> : vector<9x8xf32>
    %79 = tpu.matmul %78, %66, %cst_31 {dimension_numbers = #tpu.dot_dimension_numbers<[1], [0], [0], [1], [0, 0, 1, 1], [], []>} : vector<9x9xf32>, vector<9x8xf32>, vector<9x8xf32> -> vector<9x8xf32>
    %80 = vector.extract_strided_slice %31 {offsets = [0, 24], sizes = [9, 8], strides = [1, 1]} : vector<9x96xf32> to vector<9x8xf32>
    %81 = vector.extract_strided_slice %31 {offsets = [0, 56], sizes = [9, 8], strides = [1, 1]} : vector<9x96xf32> to vector<9x8xf32>
    %82 = vector.extract_strided_slice %31 {offsets = [0, 88], sizes = [9, 8], strides = [1, 1]} : vector<9x96xf32> to vector<9x8xf32>
    %cst_32 = arith.constant dense<0.000000e+00> : vector<9x9xf32>
    %83 = tpu.matmul %80, %81, %cst_32 {dimension_numbers = #tpu.dot_dimension_numbers<[1], [1], [0], [0], [0, 0, 1, 0], [], []>} : vector<9x8xf32>, vector<9x8xf32>, vector<9x9xf32> -> vector<9x9xf32>
    %cst_33 = arith.constant 0.353553385 : f32
    %84 = vector.broadcast %cst_33 : f32 to vector<9x9xf32>
    %85 = arith.mulf %83, %84 : vector<9x9xf32>
    %cst_34 = arith.constant dense<0xFF800000> : vector<9xf32>
    %86 = vector.multi_reduction <maximumf>, %85, %cst_34 [1] : vector<9x9xf32> to vector<9xf32>
    %87 = vector.shape_cast %86 : vector<9xf32> to vector<9x1xf32>
    %88 = vector.broadcast %87 : vector<9x1xf32> to vector<9x9xf32>
    %89 = arith.subf %85, %88 : vector<9x9xf32>
    %90 = math.exp %89 : vector<9x9xf32>
    %cst_35 = arith.constant dense<0.000000e+00> : vector<9xf32>
    %91 = vector.multi_reduction <add>, %90, %cst_35 [1] : vector<9x9xf32> to vector<9xf32>
    %92 = vector.shape_cast %91 : vector<9xf32> to vector<9x1xf32>
    %93 = vector.broadcast %92 : vector<9x1xf32> to vector<9x9xf32>
    %94 = arith.divf %90, %93 : vector<9x9xf32>
    %cst_36 = arith.constant dense<0.000000e+00> : vector<9x8xf32>
    %95 = tpu.matmul %94, %82, %cst_36 {dimension_numbers = #tpu.dot_dimension_numbers<[1], [0], [0], [1], [0, 0, 1, 1], [], []>} : vector<9x9xf32>, vector<9x8xf32>, vector<9x8xf32> -> vector<9x8xf32>
    %96 = tpu.concatenate %47, %63, %79, %95 in 1 : vector<9x8xf32>, vector<9x8xf32>, vector<9x8xf32>, vector<9x8xf32> -> vector<9x32xf32>
    %c0_37 = arith.constant 0 : index
    %c0_38 = arith.constant 0 : index
    %c0_39 = arith.constant 0 : index
    %97 = vector.load %arg8[%c0_37, %c0_38, %c0_39] : memref<1x32x32xf32, #tpu.memory_space<vmem>>, vector<1x32x32xf32>
    %98 = vector.shape_cast %97 : vector<1x32x32xf32> to vector<32x32xf32>
    %cst_40 = arith.constant dense<0.000000e+00> : vector<9x32xf32>
    %99 = tpu.matmul %96, %98, %cst_40 {dimension_numbers = #tpu.dot_dimension_numbers<[1], [0], [0], [1], [0, 0, 1, 1], [], []>} : vector<9x32xf32>, vector<32x32xf32>, vector<9x32xf32> -> vector<9x32xf32>
    %c0_41 = arith.constant 0 : index
    %c0_42 = arith.constant 0 : index
    %c0_43 = arith.constant 0 : index
    %100 = vector.load %arg9[%c0_41, %c0_42, %c0_43] : memref<1x1x32xf32, #tpu.memory_space<vmem>>, vector<1x1x32xf32>
    %101 = vector.shape_cast %100 : vector<1x1x32xf32> to vector<1x32xf32>
    %102 = vector.broadcast %101 : vector<1x32xf32> to vector<9x32xf32>
    %103 = arith.addf %99, %102 : vector<9x32xf32>
    %104 = arith.addf %4, %103 : vector<9x32xf32>
    %c0_44 = arith.constant 0 : index
    %c0_45 = arith.constant 0 : index
    %c0_46 = arith.constant 0 : index
    %105 = vector.load %arg10[%c0_44, %c0_45, %c0_46] : memref<1x1x32xf32, #tpu.memory_space<vmem>>, vector<1x1x32xf32>
    %106 = vector.shape_cast %105 : vector<1x1x32xf32> to vector<1x32xf32>
    %c0_47 = arith.constant 0 : index
    %c0_48 = arith.constant 0 : index
    %c0_49 = arith.constant 0 : index
    %107 = vector.load %arg11[%c0_47, %c0_48, %c0_49] : memref<1x1x32xf32, #tpu.memory_space<vmem>>, vector<1x1x32xf32>
    %108 = vector.shape_cast %107 : vector<1x1x32xf32> to vector<1x32xf32>
    %cst_50 = arith.constant dense<0.000000e+00> : vector<9xf32>
    %109 = vector.multi_reduction <add>, %104, %cst_50 [1] : vector<9x32xf32> to vector<9xf32>
    %110 = vector.shape_cast %109 : vector<9xf32> to vector<9x1xf32>
    %cst_51 = arith.constant 3.200000e+01 : f32
    %111 = vector.broadcast %cst_51 : f32 to vector<9x1xf32>
    %112 = arith.divf %110, %111 : vector<9x1xf32>
    %113 = vector.broadcast %112 : vector<9x1xf32> to vector<9x32xf32>
    %114 = arith.subf %104, %113 : vector<9x32xf32>
    %115 = arith.mulf %114, %114 : vector<9x32xf32>
    %cst_52 = arith.constant dense<0.000000e+00> : vector<9xf32>
    %116 = vector.multi_reduction <add>, %115, %cst_52 [1] : vector<9x32xf32> to vector<9xf32>
    %117 = vector.shape_cast %116 : vector<9xf32> to vector<9x1xf32>
    %cst_53 = arith.constant 3.200000e+01 : f32
    %118 = vector.broadcast %cst_53 : f32 to vector<9x1xf32>
    %119 = arith.divf %117, %118 : vector<9x1xf32>
    %cst_54 = arith.constant 9.99999974E-6 : f32
    %120 = vector.broadcast %cst_54 : f32 to vector<9x1xf32>
    %121 = arith.addf %119, %120 : vector<9x1xf32>
    %122 = math.rsqrt %121 : vector<9x1xf32>
    %123 = vector.broadcast %122 : vector<9x1xf32> to vector<9x32xf32>
    %124 = arith.mulf %114, %123 : vector<9x32xf32>
    %125 = vector.broadcast %106 : vector<1x32xf32> to vector<9x32xf32>
    %126 = arith.mulf %124, %125 : vector<9x32xf32>
    %127 = vector.broadcast %108 : vector<1x32xf32> to vector<9x32xf32>
    %128 = arith.addf %126, %127 : vector<9x32xf32>
    %c0_55 = arith.constant 0 : index
    %c0_56 = arith.constant 0 : index
    %c0_57 = arith.constant 0 : index
    %129 = vector.load %arg12[%c0_55, %c0_56, %c0_57] : memref<1x32x64xf32, #tpu.memory_space<vmem>>, vector<1x32x64xf32>
    %130 = vector.shape_cast %129 : vector<1x32x64xf32> to vector<32x64xf32>
    %cst_58 = arith.constant dense<0.000000e+00> : vector<9x64xf32>
    %131 = tpu.matmul %128, %130, %cst_58 {dimension_numbers = #tpu.dot_dimension_numbers<[1], [0], [0], [1], [0, 0, 1, 1], [], []>} : vector<9x32xf32>, vector<32x64xf32>, vector<9x64xf32> -> vector<9x64xf32>
    %c0_59 = arith.constant 0 : index
    %c0_60 = arith.constant 0 : index
    %c0_61 = arith.constant 0 : index
    %132 = vector.load %arg13[%c0_59, %c0_60, %c0_61] : memref<1x1x64xf32, #tpu.memory_space<vmem>>, vector<1x1x64xf32>
    %133 = vector.shape_cast %132 : vector<1x1x64xf32> to vector<1x64xf32>
    %134 = vector.broadcast %133 : vector<1x64xf32> to vector<9x64xf32>
    %135 = arith.addf %131, %134 : vector<9x64xf32>
    %cst_62 = arith.constant 5.000000e-01 : f32
    %136 = vector.broadcast %cst_62 : f32 to vector<9x64xf32>
    %137 = arith.mulf %136, %135 : vector<9x64xf32>
    %cst_63 = arith.constant 4.471500e-02 : f32
    %138 = vector.broadcast %cst_63 : f32 to vector<9x64xf32>
    %139 = arith.mulf %138, %135 : vector<9x64xf32>
    %140 = arith.mulf %139, %135 : vector<9x64xf32>
    %141 = arith.mulf %140, %135 : vector<9x64xf32>
    %142 = arith.addf %135, %141 : vector<9x64xf32>
    %cst_64 = arith.constant 0.797884583 : f32
    %143 = vector.broadcast %cst_64 : f32 to vector<9x64xf32>
    %144 = arith.mulf %143, %142 : vector<9x64xf32>
    %145 = math.tanh %144 : vector<9x64xf32>
    %cst_65 = arith.constant 1.000000e+00 : f32
    %146 = vector.broadcast %cst_65 : f32 to vector<9x64xf32>
    %147 = arith.addf %146, %145 : vector<9x64xf32>
    %148 = arith.mulf %137, %147 : vector<9x64xf32>
    %c0_66 = arith.constant 0 : index
    %c0_67 = arith.constant 0 : index
    %c0_68 = arith.constant 0 : index
    %149 = vector.load %arg14[%c0_66, %c0_67, %c0_68] : memref<1x64x32xf32, #tpu.memory_space<vmem>>, vector<1x64x32xf32>
    %150 = vector.shape_cast %149 : vector<1x64x32xf32> to vector<64x32xf32>
    %cst_69 = arith.constant dense<0.000000e+00> : vector<9x32xf32>
    %151 = tpu.matmul %148, %150, %cst_69 {dimension_numbers = #tpu.dot_dimension_numbers<[1], [0], [0], [1], [0, 0, 1, 1], [], []>} : vector<9x64xf32>, vector<64x32xf32>, vector<9x32xf32> -> vector<9x32xf32>
    %c0_70 = arith.constant 0 : index
    %c0_71 = arith.constant 0 : index
    %c0_72 = arith.constant 0 : index
    %152 = vector.load %arg15[%c0_70, %c0_71, %c0_72] : memref<1x1x32xf32, #tpu.memory_space<vmem>>, vector<1x1x32xf32>
    %153 = vector.shape_cast %152 : vector<1x1x32xf32> to vector<1x32xf32>
    %154 = vector.broadcast %153 : vector<1x32xf32> to vector<9x32xf32>
    %155 = arith.addf %151, %154 : vector<9x32xf32>
    %156 = arith.addf %104, %155 : vector<9x32xf32>
    %c0_73 = arith.constant 0 : index
    %c0_74 = arith.constant 0 : index
    %c0_75 = arith.constant 0 : index
    %157 = vector.load %arg16[%c0_73, %c0_74, %c0_75] : memref<1x9x32xf32, #tpu.memory_space<vmem>>, vector<1x9x32xf32>
    %158 = vector.shape_cast %157 : vector<1x9x32xf32> to vector<9x32xf32>
    %159 = vector.shape_cast %156 : vector<9x32xf32> to vector<1x9x32xf32>
    tpu.vector_store %arg16[%c0_73, %c0_74, %c0_75], %159 {strides = array<i32>} : memref<1x9x32xf32, #tpu.memory_space<vmem>>, vector<1x9x32xf32>,
    return
  }
  func.func @transform_0(%arg0: i32, %arg1: i32) -> (i32, i32, i32) {
    %c0_i32 = arith.constant 0 : i32
    %c0_i32_0 = arith.constant 0 : i32
    %c0_i32_1 = arith.constant 0 : i32
    return %arg0, %c0_i32, %c0_i32_0 : i32, i32, i32
  }
  func.func @transform_1(%arg0: i32, %arg1: i32) -> (i32, i32) {
    %c0_i32 = arith.constant 0 : i32
    %c0_i32_0 = arith.constant 0 : i32
    %c0_i32_1 = arith.constant 0 : i32
    return %c0_i32, %c0_i32_0 : i32, i32
  }
  func.func @transform_2(%arg0: i32, %arg1: i32) -> (i32, i32) {
    %c0_i32 = arith.constant 0 : i32
    %c0_i32_0 = arith.constant 0 : i32
    %c0_i32_1 = arith.constant 0 : i32
    return %c0_i32, %c0_i32_0 : i32, i32
  }
  func.func @transform_3(%arg0: i32, %arg1: i32) -> (i32, i32, i32) {
    %c0_i32 = arith.constant 0 : i32
    %c0_i32_0 = arith.constant 0 : i32
    %c0_i32_1 = arith.constant 0 : i32
    return %arg1, %c0_i32, %c0_i32_0 : i32, i32, i32
  }
  func.func @transform_4(%arg0: i32, %arg1: i32) -> (i32, i32, i32) {
    %c0_i32 = arith.constant 0 : i32
    %c0_i32_0 = arith.constant 0 : i32
    %c0_i32_1 = arith.constant 0 : i32
    return %arg1, %c0_i32, %c0_i32_0 : i32, i32, i32
  }
  func.func @transform_5(%arg0: i32, %arg1: i32) -> (i32, i32, i32) {
    %c0_i32 = arith.constant 0 : i32
    %c0_i32_0 = arith.constant 0 : i32
    %c0_i32_1 = arith.constant 0 : i32
    return %arg1, %c0_i32, %c0_i32_0 : i32, i32, i32
  }
  func.func @transform_6(%arg0: i32, %arg1: i32) -> (i32, i32, i32) {
    %c0_i32 = arith.constant 0 : i32
    %c0_i32_0 = arith.constant 0 : i32
    %c0_i32_1 = arith.constant 0 : i32
    return %arg1, %c0_i32, %c0_i32_0 : i32, i32, i32
  }
  func.func @transform_7(%arg0: i32, %arg1: i32) -> (i32, i32, i32) {
    %c0_i32 = arith.constant 0 : i32
    %c0_i32_0 = arith.constant 0 : i32
    %c0_i32_1 = arith.constant 0 : i32
    return %arg1, %c0_i32, %c0_i32_0 : i32, i32, i32
  }
  func.func @transform_8(%arg0: i32, %arg1: i32) -> (i32, i32, i32) {
    %c0_i32 = arith.constant 0 : i32
    %c0_i32_0 = arith.constant 0 : i32
    %c0_i32_1 = arith.constant 0 : i32
    return %arg1, %c0_i32, %c0_i32_0 : i32, i32, i32
  }
  func.func @transform_9(%arg0: i32, %arg1: i32) -> (i32, i32, i32) {
    %c0_i32 = arith.constant 0 : i32
    %c0_i32_0 = arith.constant 0 : i32
    %c0_i32_1 = arith.constant 0 : i32
    return %arg1, %c0_i32, %c0_i32_0 : i32, i32, i32
  }
  func.func @transform_10(%arg0: i32, %arg1: i32) -> (i32, i32, i32) {
    %c0_i32 = arith.constant 0 : i32
    %c0_i32_0 = arith.constant 0 : i32
    %c0_i32_1 = arith.constant 0 : i32
    return %arg1, %c0_i32, %c0_i32_0 : i32, i32, i32
  }
  func.func @transform_11(%arg0: i32, %arg1: i32) -> (i32, i32, i32) {
    %c0_i32 = arith.constant 0 : i32
    %c0_i32_0 = arith.constant 0 : i32
    %c0_i32_1 = arith.constant 0 : i32
    return %arg1, %c0_i32, %c0_i32_0 : i32, i32, i32
  }
  func.func @transform_12(%arg0: i32, %arg1: i32) -> (i32, i32, i32) {
    %c0_i32 = arith.constant 0 : i32
    %c0_i32_0 = arith.constant 0 : i32
    %c0_i32_1 = arith.constant 0 : i32
    return %arg1, %c0_i32, %c0_i32_0 : i32, i32, i32
  }
  func.func @transform_13(%arg0: i32, %arg1: i32) -> (i32, i32, i32) {
    %c0_i32 = arith.constant 0 : i32
    %c0_i32_0 = arith.constant 0 : i32
    %c0_i32_1 = arith.constant 0 : i32
    return %arg1, %c0_i32, %c0_i32_0 : i32, i32, i32
  }
  func.func @transform_14(%arg0: i32, %arg1: i32) -> (i32, i32, i32) {
    %c0_i32 = arith.constant 0 : i32
    %c0_i32_0 = arith.constant 0 : i32
    %c0_i32_1 = arith.constant 0 : i32
    return %arg0, %c0_i32, %c0_i32_0 : i32, i32, i32
  }
}

</mosaic_0001>

<bundles_post_ra>
// kernel: tpu_custom_call.1
= control target key start
LH: loop header
LB: loop body
LE: loop exit
PB: predicated region body
PF: predicated region fallthrough
CT: control target
= control target key end

     0   :  { %s2978_s0 = inlined_call_operand.hbm [shape: f32[2,8,32], index: 0, kind: input, shape index: {}]   ;;  %s2979_s1 = inlined_call_operand.hbm [shape: f32[1,32], index: 1, kind: input, shape index: {}]   ;;  %s2980_s2 = inlined_call_operand.hbm [shape: f32[9,32], index: 2, kind: input, shape index: {}]   ;;  %s2981_s3 = inlined_call_operand.vmem [shape: f32[2,1,32], index: 3, kind: input, shape index: {}]   ;;  %s2982_s4 = inlined_call_operand.hbm [shape: f32[2,1,32], index: 4, kind: input, shape index: {}]   ;;  %s2983_s5 = inlined_call_operand.vmem [shape: f32[2,32,96], index: 5, kind: input, shape index: {}]   ;;  %s2984_s6 = inlined_call_operand.vmem [shape: f32[2,32,32], index: 6, kind: input, shape index: {}]   ;;  %s2985_s7 = inlined_call_operand.vmem [shape: f32[2,1,32], index: 7, kind: input, shape index: {}]   ;;  %s2986_s8 = inlined_call_operand.hbm [shape: f32[2,1,32], index: 8, kind: input, shape index: {}]   ;;  %s2987_s9 = inlined_call_operand.vmem [shape: f32[2,1,32], index: 9, kind: input, shape index: {}]   ;;  %s2988_s10 = inlined_call_operand.vmem [shape: f32[2,32,64], index: 10, kind: input, shape index: {}]   ;;  %s2989_s11 = inlined_call_operand.vmem [shape: f32[2,1,64], index: 11, kind: input, shape index: {}]   ;;  %s2990_s12 = inlined_call_operand.vmem [shape: f32[2,64,32], index: 12, kind: input, shape index: {}]   ;;  %s2991_s13 = inlined_call_operand.vmem [shape: f32[2,1,32], index: 13, kind: input, shape index: {}]   ;;  %s2992_s14 = inlined_call_operand.vmem [shape: f32[2,9,32], index: 14, kind: output, shape index: {}]  }
   0x1   :  { %3004 = sst [smem:[#allocation24_spill]] %s2978_s0 }
   0x2   :  { %3005 = sst [smem:[#allocation25_spill]] %s2979_s1 }
   0x3   :  { %3006 = sst [smem:[#allocation26_spill]] %s2980_s2 }
   0x4   :  { %3007 = sst [smem:[#allocation27_spill]] %s2981_s3 }
   0x5   :  { %3008 = sst [smem:[#allocation28_spill]] %s2982_s4 }
   0x6   :  { %3009 = sst [smem:[#allocation29_spill]] %s2983_s5 }
   0x7   :  { %3010 = sst [smem:[#allocation30_spill]] %s2984_s6 }
   0x8   :  { %3011 = sst [smem:[#allocation31_spill]] %s2985_s7 }
   0x9   :  { %3012 = sst [smem:[#allocation32_spill]] %s2986_s8 }
   0xa   :  { %3013 = sst [smem:[#allocation33_spill]] %s2987_s9 }
   0xb   :  { %3014 = sst [smem:[#allocation34_spill]] %s2988_s10 }
   0xc   :  { %3015 = sst [smem:[#allocation35_spill]] %s2989_s11 }
   0xd   :  { %3016 = sst [smem:[#allocation36_spill]] %s2990_s12 }
   0xe   :  { %3017 = sst [smem:[#allocation37_spill]] %s2991_s13 }
   0xf   :  { %3018 = sst [smem:[#allocation38_spill]] %s2992_s14 }
  0x10   :  { %19 = vsyncpa [#allocation3], 0 }
  0x11   :  { %21 = vsyncpa [#allocation3 + $0x1], 0 }
  0x12   :  { %22 = vsyncpa [#allocation5], 0 }
  0x13   :  { %23 = vsyncpa [#allocation8], 0 }
  0x14   :  { %25 = vsyncpa [#allocation8 + $0x1], 0  ;;  %s2434_s29 = smov 0   ;;  %s2436_s30 = smov 0  }
  0x15   :  { %s2438_s15 = smov 0   ;;  %s2440_s16 = smov 0  }
  0x16   :  { %s2442_s17 = smov 0   ;;  %s2444_s18 = smov 0  }
  0x17   :  { %s2446_s19 = smov 0   ;;  %s2448_s20 = smov 0  }
  0x18   :  { %s2450_s21 = smov 0   ;;  %s2452_s22 = smov 0  }
  0x19   :  { %s2454_s23 = smov 0  }
  0x1a LB: > { %3019 = sst [smem:[#allocation13_spill]] %s2302_s30  ;;  %s2993_s24 = sadd.s32 4294967295, %s2338_s23   ;;  %s2338_s23 = sphi %s2454_s23, %s31_s23   ;;  %s2334_s22 = sphi %s2452_s22, %s3074_s22   ;;  %s2330_s21 = sphi %s2450_s21, %s3073_s21   ;;  %s2326_s20 = sphi %s2448_s20, %s3072_s20   ;;  %s2322_s19 = sphi %s2446_s19, %s3071_s19   ;;  %s2318_s18 = sphi %s2444_s18, %s3070_s18   ;;  %s2314_s17 = sphi %s2442_s17, %s3069_s17   ;;  %s2310_s16 = sphi %s2440_s16, %s3068_s16   ;;  %s2306_s15 = sphi %s2438_s15, %s3067_s15   ;;  %s2302_s30 = sphi %s2436_s30, %s3066_s30   ;;  %s2298_s29 = sphi %s2434_s29, %s3065_s29  }
  0x1b   : > { %3020 = sst [smem:[#allocation14_spill]] %s2306_s15  ;;  %p1830_p0 = scmp.ge.s32.totalorder %s2338_s23, 1 }
  0x1c   : > { %3021 = sst [smem:[#allocation15_spill]] %s2314_s17  ;;  %p2493_p1 = scmp.eq.s32.totalorder %s2993_s24, 0 }
  0x1d   : > { %3022 = sst [smem:[#allocation16_spill]] %s2318_s18  ;;  %p428_p2 = scmp.lt.s32.totalorder %s2338_s23, 5 }
  0x1e   : > { %3023 = sst [smem:[#allocation17_spill]] %s2326_s20  ;;  %s2340_s24 = smov [#allocation4]  }
  0x1f   : > { %3024 = sst [smem:[#allocation18_spill]] %s2330_s21  ;;  %p2501_p3 = pnand %p1830_p0, %p428_p2 }
  0x20   : > { %3025 = sst [smem:[#allocation19_spill]] %s2334_s22  ;;  %s442_s12 = sshll.u32 %s2340_s24, 4  ;;  %s443_s12 = int_to_ptr.vmem [resolvable:$true] %s442_s12 }
  0x21   : > { %s3027_s1 = sld [smem:[#allocation25_spill]]  ;;  %p1908_p4 = pneg %p2501_p3 }
  0x22   : > { %s40_s27 = sadd.s32 1, %s2330_s21  ;;  %p58_p7 = scmp.eq.s32.totalorder %s2338_s23, 0 }
  0x23   : > { %p2509_p5 = pnand %p1908_p4, %p2493_p1  ;;  %p2516_p6 = scmp.ge.s32.totalorder %s40_s27, 2 }
  0x24   : > { %s144_s24 = sadd.s32 1, %s2306_s15  ;;  %p151_p8 = scmp.ne.s32.totalorder %s2306_s15, %s2302_s30 }
  0x25   : > { %s3076_s27 = smov (%p2516_p6, %s40_s27), 0  ;;  %p157_p10 = scmp.ne.s32.totalorder %s2302_s30, %s2298_s29 }
  0x26   : > { %3031 = sst [smem:[#allocation20_spill]] %s3076_s27  ;;  %p2530_p9 = por %p151_p8, %p58_p7 }
  0x27   : > { %s440_s28 = sshll.u32 %s3027_s1, 4  ;;  %p1927_p11 = scmp.lt.s32.totalorder %s2338_s23, 4  ;;  %s441_s28 = int_to_ptr.hbm [resolvable:$true] %s440_s28 }
  0x28   : > { %1911 = dma.hbm_to_vmem [thread:$0]  (!%p2509_p5), %s441_s28, 16, %s443_s12, [#allocation5]  }
  0x29   : > { %s141_s12 = ssub.s32 %s2330_s21, %s3076_s27  ;;  %p2541_p13 = por %p157_p10, %p2493_p1 }
  0x2a   : > { %p142_p12 = scmp.eq.s32.totalorder %s141_s12, 0  ;;  %s492_s11 = sand.u32 1, %s2338_s23  }
  0x2b   : > { %s2994_s10 = sand.u32 1, %s2306_s15   ;;  %s3035_s4 = sld [smem:[#allocation28_spill]] }
  0x2c   : > { %s2548_s9 = scalar_select %p142_p12, %s2306_s15, %s144_s24  }
  0x2d   : > { %s495_s3 = scalar_lea.vmem [#allocation7], %s2994_s10  ;;  %p2560_p0 = pnand %p1927_p11, %p2530_p9 }
  0x2e   : > { %3034 = sst [smem:[#allocation21_spill]] %s2548_s9  ;;  %s502_s29 = sshll.u32 %s495_s3, 4  ;;  %s503_s29 = int_to_ptr.vmem [resolvable:$true] %s502_s29 }
  0x2f   : > { %s3037_s2 = sld [smem:[#allocation26_spill]]  ;;  %s2341_s13 = smov [#allocation6]  }
  0x30   : > { %s453_s10 = sshll.u32 %s2341_s13, 4  ;;  %s2343_s6 = smov 8   ;;  %s454_s10 = int_to_ptr.vmem [resolvable:$true] %s453_s10 }
  0x31   : > { %s498_s5 = scalar_lea.hbm %s3035_s4, %s2330_s21  ;;  %s2342_s4 = smov 128  }
  0x32   : > { %s500_s12 = sshll.u32 %s498_s5, 4  ;;  %s2567_s5 = scalar_lea.sflag [#allocation8], %s492_s11  ;;  %s501_s12 = int_to_ptr.hbm [resolvable:$true] %s500_s12 }
  0x33   : > { %1921 = dma.hbm_to_vmem [thread:$0]  (!%p2560_p0), %s501_s12, 16, %s503_s29, %s2567_s5  }
  0x34   : > { %s43_s7 = sadd.s32 1, %s2334_s22  ;;  %p57_p2 = scmp.ne.s32.totalorder %s2318_s18, %s2314_s17 }
  0x35   : > { %s451_s3 = sshll.u32 %s3037_s2, 4  ;;  %s3078_s7 = smov (!%p2516_p6, %s43_s7), %s2334_s22  ;;  %s452_s3 = int_to_ptr.hbm [resolvable:$true] %s451_s3 }
  0x36   : > { %1914 = dma.hbm_to_vmem [thread:$0]  (!%p2509_p5), %s452_s3, 256, %s454_s10, [#allocation5], %s2342_s4, %s2342_s4, %s2343_s6  }
  0x37   : > { %s50_s2 = sadd.s32 1, %s2318_s18  ;;  %p45_p4 = scmp.ge.s32.totalorder %s3078_s7, 2 }
  0x38   : > { %p63_p8 = scmp.ne.s32.totalorder %s2314_s17, %s2310_s16  ;;  %p2585_p9 = por %p58_p7, %p57_p2 }
  0x39   : > { %s467_s29 = sand.u32 1, %s2318_s18   ;;  %s3080_s7 = smov (%p45_p4, %s3078_s7), 0 }
  0x3a   : > { %3039 = sst [smem:[#allocation22_spill]] %s3080_s7  ;;  %p2594_p5 = por %p2493_p1, %p63_p8 }
  0x3b   : > { %s47_s4 = ssub.s32 %s2334_s22, %s3080_s7  ;;  %s1834_s10 = sshll.u32 %s467_s29, 3 }
  0x3c   : > { %p48_p6 = scmp.eq.s32.totalorder %s47_s4, 0  ;;  %s1835_s16 = sshll.u32 %s2334_s22, 3 }
  0x3d   : > { %s471_s26 = scalar_lea.vmem [#allocation2], %s1834_s10  ;;  %s3042_s0 = sld [smem:[#allocation24_spill]] }
  0x3e   : > { %s479_s12 = sshll.u32 %s471_s26, 4  ;;  %p1916_p7 = pnand %p1927_p11, %p2585_p9  ;;  %s480_s12 = int_to_ptr.vmem [resolvable:$true] %s479_s12 }
  0x3f   : > { %s2602_s3 = scalar_select %p48_p6, %s2318_s18, %s50_s2  }
  0x40   : > { %s3043_s8 = sld [smem:[#allocation32_spill]]  ;;  %s468_s22 = scalar_lea.sflag [#allocation3], %s467_s29 }
  0x41   : > { %3041 = sst [smem:[#allocation23_spill]] %s2602_s3  ;;  %s3044_s2 = sand.u32 1, %s2306_s15  }
  0x42   : > { %s534_s26 = scalar_lea.vmem [#allocation9], %s3044_s2 }
  0x43   : > { %s475_s27 = scalar_lea.hbm %s3042_s0, %s1835_s16  ;;  %s541_s3 = sshll.u32 %s534_s26, 4  ;;  %s542_s3 = int_to_ptr.vmem [resolvable:$true] %s541_s3 }
  0x44   : > { %s477_s9 = sshll.u32 %s475_s27, 4  ;;  %584 = sbr.rel (%p2501_p3) target bundleno = 2019 (0x7e3), region = 76  ;;  %s478_s9 = int_to_ptr.hbm [resolvable:$true] %s477_s9 }
  0x45   : > { %1918 = dma.hbm_to_vmem [thread:$0]  (!%p1916_p7), %s478_s9, 128, %s480_s12, %s468_s22  }
  0x46   : > { %s537_s4 = scalar_lea.hbm %s3043_s8, %s2330_s21  ;;  %s586_s27 = sand.u32 (!%p2501_p3), 1, %s2314_s17  }
  0x47   : > { %s539_s10 = sshll.u32 %s537_s4, 4  ;;  %s2623_s11 = sshll.u32 (!%p2501_p3), %s586_s27, 3  ;;  %s540_s10 = int_to_ptr.hbm [resolvable:$true] %s539_s10 }
  0x48   : > { %1924 = dma.hbm_to_vmem [thread:$0]  (!%p2560_p0), %s540_s10, 16, %s542_s3, %s2567_s5  }
  0x49   : > { %s587_s20 = scalar_lea.sflag [#allocation3], %s586_s27 }
  0x4a   : > { %2285 = dma.done.wait (%p2594_p5), %s587_s20, 128  }
  0x4b   : > { %2287 = vsyncadd (%p2594_p5), %s587_s20, 4294967168 }
  0x4c   : > { %2289 = dma.done.wait (%p2493_p1), [#allocation5], 272  }
  0x4d   : > { %2291 = vsyncadd (%p2493_p1), [#allocation5], 4294967024  ;;  %s3045_s9 = sadd.s32 4294967295, %s2338_s23   ;;  %s608_s22 = sand.u32 1, %s2302_s30  }
  0x4e   : > { %s606_s14 = sand.u32 1, %s3045_s9   ;;  %s2637_s5 = scalar_lea.vmem [#allocation7], %s608_s22 }
  0x4f   : > { %s607_s24 = scalar_lea.sflag [#allocation8], %s606_s14 }
  0x50   : > { %2293 = dma.done.wait (%p2541_p13), %s607_s24, 32  }
  0x51   : > { %2295 = vsyncadd (%p2541_p13), %s607_s24, 4294967264  ;;  %s3046_s29 = sld [smem:[#allocation17_spill]]  ;;  %p707_p3 = scmp.lt.s32.totalorder %s2322_s19, 1 }
  0x52   : > { %s3048_s4 = sld [smem:[#allocation29_spill]]  ;;  %p1850_p10 = scmp.ne.s32.totalorder %s2322_s19, 0 }
  0x53   : > { %s2646_s25 = scalar_select %p707_p3, %s2322_s19, 1 }
  0x54   : > { %s3049_s27 = sld [smem:[#allocation30_spill]] }
  0x55   : > { %s1889_s3 = sshll.u32 %s2646_s25, 5  ;;  %s3051_s21 = sld [smem:[#allocation33_spill]] }
  0x56   : > { %s3052_s12 = sld [smem:[#allocation34_spill]]  ;;  %s1892_s2 = sshll.u32 %s2646_s25, 6 }
  0x57   : > { %p742_p1 = scmp.lt.s32.totalorder %s3046_s29, 1  ;;  %s3054_s15 = sld [smem:[#allocation37_spill]] }
  0x58   : > { %s2657_s10 = scalar_lea.vmem %s3048_s4, %s1889_s3  ;;  %s3053_s4 = sld [smem:[#allocation35_spill]] }
  0x59   : > { %s3082_s29 = smov (!%p742_p1, %s3046_s29), 1  ;;  %s3055_s24 = sld [smem:[#allocation36_spill]] }
  0x5a   : > { %s2662_s20 = scalar_lea.vmem %s3049_s27, %s1889_s3  ;;  %s1893_s0 = sshll.u32 %s3082_s29, 4 }
  0x5b   : > { %s725_s1 = scalar_lea.vmem %s3051_s21, %s2646_s25  ;;  %s3056_s16 = sld [smem:[#allocation38_spill]] }
  0x5c   : > { %s2675_s18 = scalar_lea.vmem %s3052_s12, %s1889_s3  ;;  %s2696_s3 = scalar_lea.vmem [#allocation9], %s608_s22 }
  0x5d   : > { %s741_s30 = scalar_lea.vmem %s3054_s15, %s2646_s25  ;;  %750 = sbr.rel (%p1850_p10) target bundleno = 108 (0x6c), region = 100 }
  0x5e   : > { %s733_s17 = scalar_lea.vmem %s3053_s4, %s2646_s25  ;;  %s3057_s15 = scalar_lea.vmem (!%p1850_p10), [#allocation2], %s2623_s11 }
  0x5f   : > { %s2689_s7 = scalar_lea.vmem %s3055_s24, %s1892_s2 }
  0x61   : > { %s2694_s12 = scalar_lea.vmem %s3056_s16, %s1893_s0 }
  0x62   : > { %v751_v0 = vld [vmem:[#allocation6] sm:$0xff]  ;;  %v752_v1 = vld [vmem:[#allocation6 + $0x8] sm:$0x1]  ;;  %vm758_vm0 = vcmask 1046528   ;;  %v753_v2 = vld [vmem:[#allocation4] sm:$0x1] }
  0x63   : > { %v755_v3 = vld [vmem:[%s3057_s15] sm:$0xff]  ;;  %v759_v4 = vrot.slane %v751_v0, 1  ;;  %v760_v5 = vrot.slane %v752_v1, 1  ;;  %v754_v7 = vadd.f32 %v753_v2, %v751_v0  ;;  %vm767_vm1 = vcmask 1040384  }
  0x64   : > { %vm771_vm2 = vcmask 253952   ;;  %vm769_vm3 = vcmask 261120  }
  0x65   : > { %v761_v6 = vsel %vm758_vm0, %v759_v4, %v760_v5 }
  0x66   : > { %v763_v8 = vadd.f32 %v761_v6, %v755_v3 }
  0x68   : > { %v765_v9 = vrot.slane %v763_v8, 7 }
  0x6a   : > { %v768_v10 = vsel %vm767_vm1, %v754_v7, %v765_v9  ;;  %772 = vst.msk [vmem:[%s2694_s12 + $0x8] sm:$0x1] %vm771_vm2, %v765_v9 }
  0x6b   : > { %770 = vst.msk [vmem:[%s2694_s12] sm:$0xff] %vm769_vm3, %v768_v10 }
  0x6c PF: > { %vm777_vm4 = vcmask 261120   ;;  %vm781_vm5 = vcmask 253952   ;;  %v2344_v15 = vmov 32.0   ;;  %v843_v32 = vld [vmem:[%s2657_s10 + $0x18] sm:$0xff]  ;;  %v842_v33 = vld [vmem:[%s2657_s10 + $0x10] sm:$0xff]  ;;  %v841_v34 = vld [vmem:[%s2657_s10 + $0x8] sm:$0xff] }
  0x6d   : > { %2044 = vrcp.f32 %v2344_v15  ;;  %862 = vmatpush.msra.mxu0 %v843_v32  ;;  %v840_v35 = vld [vmem:[%s2657_s10] sm:$0xff]  ;;  %s3058_s22 = sld [smem:[#allocation27_spill]]  ;;  %s2345_s10 = smov 88   ;;  %vm879_vm13 = vcmask 64512   ;;  %vm974_vm14 = vcmask 1040384   ;;  %vm913_vm15 = vcmask 72704  }
  0x6e   : > { %v2038_v54 = vld [vmem:[%s2637_s5] ss:$0 sm:$0xff]  ;;  %s2346_s5 = smov 80   ;;  %s2347_s28 = smov 96   ;;  %vm917_vm0 = vcmask 65536  }
  0x6f   : > { %863 = vmatpush.msra.mxu0 %v842_v33  ;;  %s2348_s13 = smov 112   ;;  %s2349_s6 = smov 72  }
  0x70   : > { %s2350_s4 = smov 120   ;;  %s2351_s2 = smov 64  }
  0x71   : > { %v2709_v13 = vld [vmem:[%s2694_s12 + $0x8] sm:$0x1]  ;;  %864 = vmatpush.msra.mxu0 %v841_v34  ;;  %s2352_s26 = smov 104   ;;  %s2353_s27 = smov 56  }
  0x72   : > { %v2704_v11 = vld [vmem:[%s2694_s12] sm:$0xff]  ;;  %v782_v14 = vsel %vm781_vm5, %v2709_v13, 0.0  ;;  %s2354_s9 = smov 40   ;;  %s2355_s14 = smov 48  }
  0x73   : > { %v778_v12 = vsel %vm777_vm4, %v2704_v11, 0.0  ;;  %v2045_v16 = vpop.eup %2044  ;;  %865 = vmatpush.msra.mxu0 %v840_v35  ;;  %s3059_s29 = scalar_lea.vmem %s3058_s22, %s2646_s25  ;;  %s2356_s24 = smov 8  }
  0x74   : > { %779 = vadd.xlane.f32.xlu0 %v778_v12  ;;  %v786_v17 = vmul.f32 32.0, %v2045_v16  ;;  %vm790_vm6 = vweird.f32 %v2045_v16  ;;  %v2037_v50 = vld [vmem:[%s3059_s29] ss:$0 sm:$0xff]  ;;  %s2357_s0 = smov 24   ;;  %s2358_s8 = smov 16  }
  0x75   : > { %s3060_s16 = sld [smem:[#allocation31_spill]] }
  0x76   : > { %v787_v18 = vsub.f32 1.0, %v786_v17 }
  0x78   : > { %v788_v19 = vmul.f32 %v2045_v16, %v787_v18 }
  0x7a   : > { %v789_v20 = vadd.f32 %v2045_v16, %v788_v19 }
  0x7b   : > { %s3061_s15 = scalar_lea.vmem %s3060_s16, %s2646_s25 }
  0x7c   : > { %783 = vadd.xlane.f32.xlu0 %v782_v14  ;;  %v2713_v21 = vsel %vm790_vm6, %v2045_v16, %v789_v20 }
  0xe7   : > { %v780_v22 = vpop.xlane.xlu0 %779 }
  0xe8   : > { %v792_v23 = vmul.f32 %v2713_v21, %v780_v22 }
  0xea   : > { %v794_v24 = vsub.f32 %v2704_v11, %v792_v23 }
  0xec   : > { %v796_v25 = vmul.f32 %v794_v24, %v794_v24 }
  0xee   : > { %v798_v26 = vsel %vm777_vm4, %v796_v25, 0.0 }
  0xef   : > { %799 = vadd.xlane.f32.xlu1 %v798_v26  ;;  %v784_v27 = vpop.xlane.xlu0 %783 }
  0xf0   : > { %v793_v28 = vmul.f32 %v2713_v21, %v784_v27 }
  0xf2   : > { %v795_v29 = vsub.f32 %v2709_v13, %v793_v28 }
  0xf4   : > { %v797_v30 = vmul.f32 %v795_v29, %v795_v29 }
  0xf6   : > { %v801_v31 = vsel %vm781_vm5, %v797_v30, 0.0 }
  0xf7   : > { %802 = vadd.xlane.f32.xlu1 %v801_v31 }
 0x162   : > { %v800_v36 = vpop.xlane.xlu1 %799 }
 0x163   : > { %v804_v37 = vmul.f32 %v800_v36, %v2713_v21 }
 0x165   : > { %v806_v38 = vadd.f32 1e-05, %v804_v37 }
 0x167   : > { %2046 = vrsqrt.f32 %v806_v38  ;;  %vm814_vm8 = vweird.f32 %v806_v38 }
 0x16a   : > { %v803_v39 = vpop.xlane.xlu1 %802 }
 0x16b   : > { %v805_v40 = vmul.f32 %v803_v39, %v2713_v21 }
 0x16d   : > { %v2047_v41 = vpop.eup %2046  ;;  %v807_v42 = vadd.f32 1e-05, %v805_v40 }
 0x16e   : > { %v809_v43 = vmul.f32 %v2047_v41, %v806_v38  ;;  %vm815_vm7 = vweird.f32 %v2047_v41 }
 0x16f   : > { %2048 = vrsqrt.f32 %v807_v42  ;;  %vm816_vm9 = vmor %vm814_vm8, %vm815_vm7  ;;  %vm824_vm11 = vweird.f32 %v807_v42 }
 0x170   : > { %v810_v44 = vmul.f32 %v2047_v41, %v809_v43 }
 0x172   : > { %v811_v45 = vmul.f32 0.5, %v810_v44 }
 0x174   : > { %v812_v46 = vsub.f32 1.5, %v811_v45 }
 0x175   : > { %v2049_v47 = vpop.eup %2048 }
 0x176   : > { %v813_v48 = vmul.f32 %v2047_v41, %v812_v46  ;;  %v819_v49 = vmul.f32 %v2049_v47, %v807_v42  ;;  %vm825_vm10 = vweird.f32 %v2049_v47 }
 0x177   : > { %vm826_vm12 = vmor %vm824_vm11, %vm825_vm10 }
 0x178   : > { %v817_v51 = vsel %vm816_vm9, %v2047_v41, %v813_v48  ;;  %v820_v52 = vmul.f32 %v2049_v47, %v819_v49 }
 0x179   : > { %v828_v53 = vmul.f32 %v817_v51, %v794_v24 }
 0x17a   : > { %v821_v55 = vmul.f32 0.5, %v820_v52 }
 0x17b   : > { %v833_v56 = vmul.f32 %v2037_v50, %v828_v53 }
 0x17c   : > { %v822_v57 = vsub.f32 1.5, %v821_v55 }
 0x17d   : > { %v838_v58 = vadd.f32 %v2038_v54, %v833_v56 }
 0x17e   : > { %v823_v59 = vmul.f32 %v2049_v47, %v822_v57 }
 0x17f   : > { %1851 = vmatmul.msk.f32.vlgmr.msra.gmra.mxu0 %vm777_vm4, %v838_v58 }
 0x180   : > { %v827_v60 = vsel %vm826_vm12, %v2049_v47, %v823_v59 }
 0x181   : > { %v829_v61 = vmul.f32 %v827_v60, %v795_v29 }
 0x183   : > { %v834_v62 = vmul.f32 %v2037_v50, %v829_v61 }
 0x185   : > { %v839_v63 = vadd.f32 %v2038_v54, %v834_v62 }
 0x187   : > { %1852 = vmatmul.msk.f32.gmra.mxu0 %vm777_vm4, %v839_v63 }
 0x1fc   : > { %v2735_v0 = vpop.f32.mrf.mxu0 }
 0x1fd   : > { %1004 = vrot.lane.b32.xlu1 %v2735_v0, %s2345_s10 }
 0x204   : > { %v2738_v1 = vpop.f32.mrf.mxu0 }
 0x205   : > { %1131 = vrot.lane.b32.xlu1 %v2738_v1, %s2346_s5  ;;  %1006 = vrot.lane.b32.xlu0 %v2738_v1, %s2345_s10 }
 0x206   : > { %877 = vrot.lane.b32.xlu2 %v2738_v1, %s2347_s28 }
 0x20d   : > { %1125 = vrot.lane.b32.xlu1 %v2735_v0, %s2348_s13  ;;  %1254 = vrot.lane.b32.xlu0 %v2735_v0, %s2349_s6 }
 0x20e   : > { %875 = vrot.lane.b32.xlu2 %v2735_v0, %s2347_s28 }
 0x215   : > { %1129 = vrot.lane.b32.xlu0 %v2735_v0, %s2346_s5 }
 0x216   : > { %1000 = vrot.lane.b32.xlu2 %v2735_v0, %s2350_s4 }
 0x21d   : > { %1127 = vrot.lane.b32.xlu0 %v2738_v1, %s2348_s13 }
 0x21e   : > { %1002 = vrot.lane.b32.xlu2 %v2738_v1, %s2350_s4 }
 0x225   : > { %965 = vrot.lane.b32.xlu0 %v2738_v1, %s2351_s2 }
 0x226   : > { %1256 = vrot.lane.b32.xlu2 %v2738_v1, %s2349_s6 }
 0x22e   : > { %1250 = vrot.lane.b32.xlu2 %v2735_v0, %s2352_s26 }
 0x236   : > { %1252 = vrot.lane.b32.xlu2 %v2738_v1, %s2352_s26 }
 0x260   : > { %v878_v2 = vpop.permute.xlu2 %877 }
 0x261   : > { %1853 = vmatpush.xpose.msk.msra.mxu1 %vm879_vm13, %v878_v2 }
 0x268   : > { %v876_v3 = vpop.permute.xlu2 %875 }
 0x269   : > { %1854 = vmatpush.xpose.msk.msra.mxu1 %vm879_vm13, %v876_v3 }
 0x26c   : > { %1855 = vmatmul.msk.f32.vlgmr.msra.gmra.mxu1 %vm879_vm13, %v2735_v0 }
 0x26f   : > { %v1005_v4 = vpop.permute.xlu1 %1004 }
 0x270   : > { %v1001_v5 = vpop.permute.xlu2 %1000 }
 0x274   : > { %1856 = vmatmul.msk.f32.gmra.mxu1 %vm879_vm13, %v2738_v1 }
 0x277   : > { %v1007_v6 = vpop.permute.xlu0 %1006  ;;  %v1132_v7 = vpop.permute.xlu1 %1131 }
 0x278   : > { %v1003_v8 = vpop.permute.xlu2 %1002  ;;  %1860 = vmatpush.xpose.msk.msra.mxu3 %vm879_vm13, %v1007_v6  ;;  %1867 = vmatpush.xpose.msk.msrb.mxu0 %vm879_vm13, %v1132_v7 }
 0x27c   : > { %1861 = vmatpush.xpose.msk.msra.mxu3 %vm879_vm13, %v1005_v4 }
 0x27f   : > { %v1255_v9 = vpop.permute.xlu0 %1254  ;;  %1862 = vmatmul.msk.f32.vlgmr.msra.gmra.mxu3 %vm879_vm13, %v1001_v5  ;;  %v1126_v14 = vpop.permute.xlu1 %1125 }
 0x280   : > { %v1257_v10 = vpop.permute.xlu2 %1256 }
 0x281   : > { %1874 = vmatpush.xpose.msk.msrb.mxu3 %vm879_vm13, %v1257_v10 }
 0x285   : > { %1875 = vmatpush.xpose.msk.msrb.mxu3 %vm879_vm13, %v1255_v9 }
 0x287   : > { %v1130_v12 = vpop.permute.xlu0 %1129  ;;  %1863 = vmatmul.msk.f32.gmra.mxu3 %vm879_vm13, %v1003_v8 }
 0x288   : > { %1868 = vmatpush.xpose.msk.msrb.mxu0 %vm879_vm13, %v1130_v12  ;;  %v1251_v15 = vpop.permute.xlu2 %1250 }
 0x28b   : > { %1869 = vmatmul.msk.f32.vlgmr.msrb.gmra.mxu0 %vm879_vm13, %v1126_v14 }
 0x28f   : > { %v1128_v16 = vpop.permute.xlu0 %1127  ;;  %1876 = vmatmul.msk.f32.vlgmr.msrb.gmra.mxu3 %vm879_vm13, %v1251_v15 }
 0x290   : > { %v1253_v17 = vpop.permute.xlu2 %1252 }
 0x293   : > { %1870 = vmatmul.msk.f32.gmra.mxu0 %vm879_vm13, %v1128_v16 }
 0x297   : > { %v966_v18 = vpop.permute.xlu0 %965  ;;  %1877 = vmatmul.msk.f32.gmra.mxu3 %vm879_vm13, %v1253_v17 }
 0x298   : > { %1857 = vmatpush.msk.msra.mxu2 %vm974_vm14, %v966_v18 }
 0x2e9   : > { %v905_v19 = vpop.f32.mrf.mxu1 }
 0x2ea   : > { %v911_v20 = vmul.f32 0.35355338, %v905_v19 }
 0x2ec   : > { %v914_v22 = vsel %vm913_vm15, %v911_v20, -inf }
 0x2ed   : > { %915 = vmax.xlane.f32.xlu2 %v914_v22 }
 0x2f1   : > { %v908_v23 = vpop.f32.mrf.mxu1 }
 0x2f2   : > { %v912_v24 = vmul.f32 0.35355338, %v908_v23 }
 0x2f4   : > { %v918_v25 = vsel %vm917_vm0, %v912_v24, -inf }
 0x2f5   : > { %919 = vmax.xlane.f32.xlu1 %v918_v25 }
 0x302   : > { %v1033_v26 = vpop.f32.mrf.mxu3 }
 0x303   : > { %v1039_v33 = vmul.f32 0.35355338, %v1033_v26 }
 0x305   : > { %v1041_v37 = vsel %vm913_vm15, %v1039_v33, -inf }
 0x308   : > { %v1158_v27 = vpop.f32.mrf.mxu0 }
 0x309   : > { %v1164_v28 = vmul.f32 0.35355338, %v1158_v27 }
 0x30a   : > { %v1036_v29 = vpop.f32.mrf.mxu3 }
 0x30b   : > { %v1040_v30 = vmul.f32 0.35355338, %v1036_v29  ;;  %v1166_v31 = vsel %vm913_vm15, %v1164_v28, -inf }
 0x30c   : > { %1167 = vmax.xlane.f32.xlu0 %v1166_v31 }
 0x30d   : > { %v1044_v32 = vsel %vm917_vm0, %v1040_v30, -inf }
 0x30e   : > { %1045 = vmax.xlane.f32.xlu2 %v1044_v32 }
 0x310   : > { %v1161_v34 = vpop.f32.mrf.mxu0 }
 0x311   : > { %v1165_v35 = vmul.f32 0.35355338, %v1161_v34 }
 0x312   : > { %v1283_v36 = vpop.f32.mrf.mxu3 }
 0x313   : > { %v1169_v38 = vsel %vm917_vm0, %v1165_v35, -inf  ;;  %v1289_v39 = vmul.f32 0.35355338, %v1283_v36 }
 0x314   : > { %1042 = vmax.xlane.f32.xlu0 %v1041_v37  ;;  %1170 = vmax.xlane.f32.xlu1 %v1169_v38 }
 0x315   : > { %v1291_v42 = vsel %vm913_vm15, %v1289_v39, -inf }
 0x31a   : > { %v1286_v40 = vpop.f32.mrf.mxu3 }
 0x31b   : > { %v1290_v41 = vmul.f32 0.35355338, %v1286_v40 }
 0x31c   : > { %1292 = vmax.xlane.f32.xlu1 %v1291_v42 }
 0x31d   : > { %v1294_v43 = vsel %vm917_vm0, %v1290_v41, -inf }
 0x31e   : > { %1295 = vmax.xlane.f32.xlu2 %v1294_v43 }
 0x328   : > { %1091 = vrot.lane.b32.xlu0 %v2738_v1, %s2353_s27 }
 0x335   : > { %1089 = vrot.lane.b32.xlu1 %v2735_v0, %s2353_s27 }
 0x336   : > { %963 = vrot.lane.b32.xlu2 %v2735_v0, %s2351_s2 }
 0x360   : > { %v916_v44 = vpop.xlane.xlu2 %915 }
 0x361   : > { %v921_v45 = vsub.f32 %v911_v20, %v916_v44 }
 0x363   : > { %v923_v46 = vmul.f32 1.442695, %v921_v45 }
 0x365   : > { %2050 = vpow2.f32 %v923_v46 }
 0x368   : > { %v920_v49 = vpop.xlane.xlu1 %919 }
 0x369   : > { %v922_v52 = vsub.f32 %v912_v24, %v920_v49 }
 0x36b   : > { %v2786_v47 = vpop.eup %2050  ;;  %v925_v54 = vmul.f32 1.442695, %v922_v52 }
 0x36c   : > { %v927_v48 = vsel %vm913_vm15, %v2786_v47, 0.0 }
 0x36d   : > { %928 = vadd.xlane.f32.xlu0 %v927_v48 }
 0x37f   : > { %v1168_v50 = vpop.xlane.xlu0 %1167 }
 0x380   : > { %v1172_v51 = vsub.f32 %v1164_v28, %v1168_v50 }
 0x381   : > { %1339 = vrot.lane.b32.xlu0 %v2735_v0, %s2354_s9  ;;  %v1046_v58 = vpop.xlane.xlu2 %1045 }
 0x382   : > { %v1174_v53 = vmul.f32 1.442695, %v1172_v51  ;;  %v1048_v5 = vsub.f32 %v1040_v30, %v1046_v58 }
 0x384   : > { %2052 = vpow2.f32 %v1174_v53  ;;  %v1051_v8 = vmul.f32 1.442695, %v1048_v5 }
 0x385   : > { %2054 = vpow2.f32 %v925_v54 }
 0x387   : > { %v1043_v55 = vpop.xlane.xlu0 %1042  ;;  %v1171_v56 = vpop.xlane.xlu1 %1170 }
 0x388   : > { %v1047_v57 = vsub.f32 %v1039_v33, %v1043_v55  ;;  %v1173_v61 = vsub.f32 %v1165_v35, %v1171_v56 }
 0x38a   : > { %v2792_v59 = vpop.eup %2052  ;;  %v1049_v60 = vmul.f32 1.442695, %v1047_v57  ;;  %v1176_v63 = vmul.f32 1.442695, %v1173_v61 }
 0x38b   : > { %v1178_v62 = vsel %vm913_vm15, %v2792_v59, 0.0  ;;  %v2796_v2 = vpop.eup %2054 }
 0x38c   : > { %2056 = vpow2.f32 %v1049_v60  ;;  %1179 = vadd.xlane.f32.xlu2 %v1178_v62  ;;  %v930_v7 = vsel %vm917_vm0, %v2796_v2, 0.0 }
 0x38d   : > { %2058 = vpow2.f32 %v1176_v63 }
 0x38e   : > { %2060 = vpow2.f32 %v1051_v8 }
 0x38f   : > { %v1293_v9 = vpop.xlane.xlu1 %1292 }
 0x390   : > { %v1297_v15 = vsub.f32 %v1289_v39, %v1293_v9 }
 0x391   : > { %v1296_v3 = vpop.xlane.xlu2 %1295 }
 0x392   : > { %v2798_v4 = vpop.eup %2056  ;;  %v1298_v12 = vsub.f32 %v1290_v41, %v1296_v3  ;;  %v1299_v19 = vmul.f32 1.442695, %v1297_v15 }
 0x393   : > { %v1053_v6 = vsel %vm913_vm15, %v2798_v4, 0.0  ;;  %v2804_v10 = vpop.eup %2058 }
 0x394   : > { %1054 = vadd.xlane.f32.xlu1 %v1053_v6  ;;  %931 = vadd.xlane.f32.xlu2 %v930_v7  ;;  %v1181_v17 = vsel %vm917_vm0, %v2804_v10, 0.0  ;;  %v1301_v18 = vmul.f32 1.442695, %v1298_v12  ;;  %v2809_v20 = vpop.eup %2060 }
 0x395   : > { %v1056_v22 = vsel %vm917_vm0, %v2809_v20, 0.0 }
 0x396   : > { %2062 = vpow2.f32 %v1301_v18 }
 0x397   : > { %2064 = vpow2.f32 %v1299_v19 }
 0x399   : > { %v964_v14 = vpop.permute.xlu2 %963 }
 0x39a   : > { %992 = vmatpush.msra.mxu2 %v964_v14  ;;  %v1092_v16 = vpop.permute.xlu0 %1091 }
 0x39c   : > { %1864 = vmatpush.msk.msrb.mxu2 %vm974_vm14, %v1092_v16  ;;  %1182 = vadd.xlane.f32.xlu1 %v1181_v17  ;;  %v2813_v23 = vpop.eup %2062 }
 0x39d   : > { %v2815_v25 = vpop.eup %2064  ;;  %v1306_v26 = vsel %vm917_vm0, %v2813_v23, 0.0 }
 0x39e   : > { %v1303_v27 = vsel %vm913_vm15, %v2815_v25, 0.0 }
 0x3a4   : > { %1057 = vadd.xlane.f32.xlu1 %v1056_v22 }
 0x3a7   : > { %v1090_v24 = vpop.permute.xlu1 %1089 }
 0x3a8   : > { %1117 = vmatpush.msrb.mxu2 %v1090_v24 }
 0x3ab   : > { %1307 = vadd.xlane.f32.xlu0 %v1306_v26 }
 0x3ac   : > { %1341 = vrot.lane.b32.xlu2 %v2738_v1, %s2354_s9  ;;  %1304 = vadd.xlane.f32.xlu1 %v1303_v27 }
 0x3bf   : > { %1214 = vrot.lane.b32.xlu0 %v2735_v0, %s2355_s14 }
 0x3c5   : > { %1216 = vrot.lane.b32.xlu1 %v2738_v1, %s2355_s14 }
 0x3e0   : > { %v929_v28 = vpop.xlane.xlu0 %928 }
 0x3e1   : > { %2066 = vrcp.f32 %v929_v28  ;;  %v944_v32 = vand.u32 2147483648, %v929_v28  ;;  %v942_v34 = vand.u32 2147483647, %v929_v28  ;;  %vm938_vm2 = vweird.f32 %v929_v28 }
 0x3e3   : > { %v945_v36 = vor.u32 1.1754944e-38, %v944_v32  ;;  %vm943_vm6 = vcmp.eq.f32.partialorder %v942_v34, 8.507059e+37 }
 0x3e7   : > { %v2067_v29 = vpop.eup %2066 }
 0x3e8   : > { %v934_v30 = vmul.f32 %v2067_v29, %v929_v28  ;;  %vm939_vm1 = vweird.f32 %v2067_v29 }
 0x3e9   : > { %vm940_vm3 = vmor %vm938_vm2, %vm939_vm1 }
 0x3ea   : > { %v935_v31 = vsub.f32 1.0, %v934_v30 }
 0x3ec   : > { %v936_v33 = vmul.f32 %v2067_v29, %v935_v31 }
 0x3ee   : > { %v937_v35 = vadd.f32 %v2067_v29, %v936_v33 }
 0x3f0   : > { %v941_v37 = vsel %vm940_vm3, %v2067_v29, %v937_v35 }
 0x3f1   : > { %v946_v38 = vsel %vm943_vm6, %v945_v36, %v941_v37 }
 0x3f2   : > { %v947_v0 = vmul.f32 %v2786_v47, %v946_v38 }
 0x3f3   : > { %v1340_v48 = vpop.permute.xlu0 %1339 }
 0x3f4   : > { %1858 = vmatmul.msk.f32.vlgmr.msra.gmra.mxu2 %vm913_vm15, %v947_v0 }
 0x3ff   : > { %v2827_v1 = vpop.xlane.xlu2 %1179 }
 0x407   : > { %v932_v39 = vpop.xlane.xlu2 %931  ;;  %v1055_v40 = vpop.xlane.xlu1 %1054 }
 0x408   : > { %2068 = vrcp.f32 %v932_v39  ;;  %v959_v47 = vand.u32 2147483648, %v932_v39  ;;  %v957_v52 = vand.u32 2147483647, %v932_v39  ;;  %vm953_vm8 = vweird.f32 %v932_v39 }
 0x409   : > { %2070 = vrcp.f32 %v1055_v40  ;;  %v1070_v60 = vand.u32 2147483648, %v1055_v40  ;;  %vm1064_vm12 = vweird.f32 %v1055_v40  ;;  %v1068_v62 = vand.u32 2147483647, %v1055_v40 }
 0x40a   : > { %v960_v55 = vor.u32 1.1754944e-38, %v959_v47  ;;  %vm958_vm11 = vcmp.eq.f32.partialorder %v957_v52, 8.507059e+37 }
 0x40b   : > { %v1071_v5 = vor.u32 1.1754944e-38, %v1070_v60  ;;  %vm1069_vm1 = vcmp.eq.f32.partialorder %v1068_v62, 8.507059e+37 }
 0x40e   : > { %v2069_v41 = vpop.eup %2068 }
 0x40f   : > { %v2071_v42 = vpop.eup %2070  ;;  %v949_v43 = vmul.f32 %v2069_v41, %v932_v39  ;;  %v1342_v44 = vpop.permute.xlu2 %1341  ;;  %vm954_vm7 = vweird.f32 %v2069_v41 }
 0x410   : > { %v2829_v45 = vpop.xlane.xlu1 %1182  ;;  %v1060_v46 = vmul.f32 %v2071_v42, %v1055_v40  ;;  %1878 = vmatpush.msk.msra.mxu2 %vm974_vm14, %v1342_v44  ;;  %vm955_vm9 = vmor %vm953_vm8, %vm954_vm7  ;;  %vm1065_vm10 = vweird.f32 %v2071_v42 }
 0x411   : > { %v950_v49 = vsub.f32 1.0, %v949_v43  ;;  %vm1066_vm0 = vmor %vm1064_vm12, %vm1065_vm10 }
 0x412   : > { %v1061_v50 = vsub.f32 1.0, %v1060_v46  ;;  %1367 = vmatpush.msra.mxu2 %v1340_v48  ;;  %v1195_v48 = vand.u32 2147483648, %v2827_v1 }
 0x413   : > { %v951_v51 = vmul.f32 %v2069_v41, %v950_v49 }
 0x414   : > { %v1062_v53 = vmul.f32 %v2071_v42, %v1061_v50  ;;  %v1193_v50 = vand.u32 2147483647, %v2827_v1 }
 0x415   : > { %v952_v54 = vadd.f32 %v2069_v41, %v951_v51 }
 0x416   : > { %v1063_v56 = vadd.f32 %v2071_v42, %v1062_v53 }
 0x417   : > { %v956_v58 = vsel %vm955_vm9, %v2069_v41, %v952_v54 }
 0x418   : > { %v1058_v57 = vpop.xlane.xlu1 %1057  ;;  %v961_v61 = vsel %vm958_vm11, %v960_v55, %v956_v58  ;;  %v1067_v3 = vsel %vm1066_vm0, %v2071_v42, %v1063_v56  ;;  %v1196_v56 = vor.u32 1.1754944e-38, %v1195_v48 }
 0x419   : > { %2072 = vrcp.f32 %v1058_v57  ;;  %v962_v63 = vmul.f32 %v2796_v2, %v961_v61  ;;  %v1072_v8 = vsel %vm1069_vm1, %v1071_v5, %v1067_v3  ;;  %v1085_v17 = vand.u32 2147483648, %v1058_v57 }
 0x41a   : > { %2074 = vrcp.f32 %v2827_v1  ;;  %v1073_v15 = vmul.f32 %v2798_v4, %v1072_v8  ;;  %v1083_v19 = vand.u32 2147483647, %v1058_v57  ;;  %vm1079_vm3 = vweird.f32 %v1058_v57 }
 0x41b   : > { %1859 = vmatmul.msk.f32.gmra.mxu2 %vm913_vm15, %v962_v63  ;;  %v1086_v28 = vor.u32 1.1754944e-38, %v1085_v17  ;;  %vm1189_vm1 = vweird.f32 %v2827_v1  ;;  %v1208_v5 = vand.u32 2147483647, %v2829_v45  ;;  %v1409_v17 = vld [vmem:[%s2662_s20 + $0x10] sm:$0xff] }
 0x41c   : > { %vm1084_vm7 = vcmp.eq.f32.partialorder %v1083_v19, 8.507059e+37  ;;  %v1407_v19 = vld [vmem:[%s2662_s20] sm:$0xff] }
 0x41e   : > { %v2835_v7 = vpop.xlane.xlu0 %1307 }
 0x41f   : > { %v2073_v6 = vpop.eup %2072  ;;  %2076 = vrcp.f32 %v2835_v7  ;;  %v1335_v49 = vand.u32 2147483648, %v2835_v7  ;;  %v1333_v52 = vand.u32 2147483647, %v2835_v7 }
 0x420   : > { %v2837_v9 = vpop.eup %2074  ;;  %v1075_v12 = vmul.f32 %v2073_v6, %v1058_v57  ;;  %v1305_v14 = vpop.xlane.xlu1 %1304  ;;  %vm1080_vm2 = vweird.f32 %v2073_v6 }
 0x421   : > { %2078 = vrcp.f32 %v1305_v14  ;;  %v1185_v16 = vmul.f32 %v2837_v9, %v2827_v1  ;;  %vm1081_vm6 = vmor %vm1079_vm3, %vm1080_vm2  ;;  %v1320_v38 = vand.u32 2147483648, %v1305_v14  ;;  %v1318_v40 = vand.u32 2147483647, %v1305_v14 }
 0x422   : > { %2080 = vrcp.f32 %v2829_v45  ;;  %v1076_v2 = vsub.f32 1.0, %v1075_v12  ;;  %vm1314_vm9 = vweird.f32 %v1305_v14  ;;  %vm1190_vm10 = vweird.f32 %v2837_v9 }
 0x423   : > { %1865 = vmatmul.msk.f32.vlgmr.msrb.gmra.mxu2 %vm913_vm15, %v1073_v15  ;;  %v1186_v27 = vsub.f32 1.0, %v1185_v16  ;;  %vm1319_vm12 = vcmp.eq.f32.partialorder %v1318_v40, 8.507059e+37  ;;  %vm1191_vm2 = vmor %vm1189_vm1, %vm1190_vm10  ;;  %vm1329_vm3 = vweird.f32 %v2835_v7  ;;  %v1336_v57 = vor.u32 1.1754944e-38, %v1335_v49  ;;  %v1410_v16 = vld [vmem:[%s2662_s20 + $0x18] sm:$0xff] }
 0x424   : > { %v1077_v18 = vmul.f32 %v2073_v6, %v1076_v2  ;;  %vm1204_vm10 = vweird.f32 %v2829_v45  ;;  %1433 = vmatpush.msra.mxu0 %v1410_v16 }
 0x425   : > { %v2077_v22 = vpop.eup %2076  ;;  %v1187_v36 = vmul.f32 %v2837_v9, %v1186_v27 }
 0x426   : > { %v1078_v24 = vadd.f32 %v2073_v6, %v1077_v18  ;;  %v1325_v29 = vmul.f32 %v2077_v22, %v2835_v7  ;;  %vm1330_vm0 = vweird.f32 %v2077_v22  ;;  %v1408_v18 = vld [vmem:[%s2662_s20 + $0x8] sm:$0xff]  ;;  %1434 = vmatpush.msra.mxu0 %v1409_v17 }
 0x427   : > { %v2079_v26 = vpop.eup %2078  ;;  %v1188_v42 = vadd.f32 %v2837_v9, %v1187_v36 }
 0x428   : > { %v2846_v30 = vpop.eup %2080  ;;  %v1310_v4 = vmul.f32 %v2079_v26, %v1305_v14  ;;  %v1082_v31 = vsel %vm1081_vm6, %v2073_v6, %v1078_v24  ;;  %v1326_v32 = vsub.f32 1.0, %v1325_v29  ;;  %vm1315_vm8 = vweird.f32 %v2079_v26  ;;  %vm1331_vm6 = vmor %vm1329_vm3, %vm1330_vm0  ;;  %1435 = vmatpush.msra.mxu0 %v1408_v18 }
 0x429   : > { %v1087_v33 = vsel %vm1084_vm7, %v1086_v28, %v1082_v31  ;;  %v1200_v37 = vmul.f32 %v2846_v30, %v2829_v45  ;;  %vm1316_vm11 = vmor %vm1314_vm9, %vm1315_vm8  ;;  %v1192_v54 = vsel %vm1191_vm2, %v2837_v9, %v1188_v42  ;;  %vm1194_vm7 = vcmp.eq.f32.partialorder %v1193_v50, 8.507059e+37 }
 0x42a   : > { %v1311_v34 = vsub.f32 1.0, %v1310_v4  ;;  %v1088_v35 = vmul.f32 %v2809_v20, %v1087_v33  ;;  %v1327_v0 = vmul.f32 %v2077_v22, %v1326_v32  ;;  %v1321_v20 = vor.u32 1.1754944e-38, %v1320_v38  ;;  %1436 = vmatpush.msra.mxu0 %v1407_v19  ;;  %v1564_v19 = vld [vmem:[%s2689_s7 + $0x38] sm:$0xff] }
 0x42b   : > { %v1201_v43 = vsub.f32 1.0, %v1200_v37  ;;  %vm1334_vm8 = vcmp.eq.f32.partialorder %v1333_v52, 8.507059e+37  ;;  %v1197_v58 = vsel %vm1194_vm7, %v1196_v56, %v1192_v54  ;;  %vm1205_vm9 = vweird.f32 %v2846_v30  ;;  %v1504_v52 = vld [vmem:[%s2675_s18 + $0x10] sm:$0xff]  ;;  %v1502_v54 = vld [vmem:[%s2675_s18] sm:$0xff]  ;;  %1584 = vmatpush.msra.mxu3 %v1564_v19 }
 0x42c   : > { %v1312_v39 = vmul.f32 %v2079_v26, %v1311_v34  ;;  %1866 = vmatmul.msk.f32.gmra.mxu2 %vm913_vm15, %v1088_v35  ;;  %v1328_v46 = vadd.f32 %v2077_v22, %v1327_v0  ;;  %v1198_v63 = vmul.f32 %v2792_v59, %v1197_v58  ;;  %v2039_v35 = vld [vmem:[%s3061_s15] ss:$0 sm:$0xff]  ;;  %vm1569_vm7 = vcmask 523264  }
 0x42d   : > { %v1202_v53 = vmul.f32 %v2846_v30, %v1201_v43 }
 0x42e   : > { %v1313_v41 = vadd.f32 %v2079_v26, %v1312_v39  ;;  %v1332_v55 = vsel %vm1331_vm6, %v2077_v22, %v1328_v46 }
 0x42f   : > { %v1337_v1 = vsel %vm1334_vm8, %v1336_v57, %v1332_v55  ;;  %v1203_v61 = vadd.f32 %v2846_v30, %v1202_v53  ;;  %v1503_v53 = vld [vmem:[%s2675_s18 + $0x8] sm:$0xff] }
 0x430   : > { %v1317_v44 = vsel %vm1316_vm11, %v2079_v26, %v1313_v41  ;;  %v1338_v3 = vmul.f32 %v2813_v23, %v1337_v1  ;;  %vm1206_vm11 = vmor %vm1204_vm10, %vm1205_vm9 }
 0x431   : > { %v1322_v47 = vsel %vm1319_vm12, %v1321_v20, %v1317_v44  ;;  %v1215_v62 = vpop.permute.xlu0 %1214  ;;  %v1207_v6 = vsel %vm1206_vm11, %v2846_v30, %v1203_v61  ;;  %vm1209_vm12 = vcmp.eq.f32.partialorder %v1208_v5, 8.507059e+37 }
 0x432   : > { %v1323_v51 = vmul.f32 %v2815_v25, %v1322_v47  ;;  %v1210_v25 = vand.u32 2147483648, %v2829_v45 }
 0x434   : > { %1879 = vmatmul.msk.f32.vlgmr.msra.gmra.mxu2 %vm913_vm15, %v1323_v51  ;;  %v1211_v7 = vor.u32 1.1754944e-38, %v1210_v25  ;;  %v1505_v51 = vld [vmem:[%s2675_s18 + $0x18] sm:$0xff] }
 0x436   : > { %v1212_v8 = vsel %vm1209_vm12, %v1211_v7, %v1207_v6  ;;  %v2040_v7 = vld [vmem:[%s2696_s3] ss:$0 sm:$0xff] }
 0x437   : > { %v1217_v60 = vpop.permute.xlu1 %1216  ;;  %v1213_v9 = vmul.f32 %v2804_v10, %v1212_v8 }
 0x438   : > { %1871 = vmatpush.msk.msrb.mxu1 %vm974_vm14, %v1217_v60  ;;  %vm1401_vm14 = vcmask 130048  }
 0x43a   : > { %1242 = vmatpush.msrb.mxu1 %v1215_v62 }
 0x43b   : > { %1872 = vmatmul.msk.f32.vlgmr.msrb.gmra.mxu1 %vm913_vm15, %v1198_v63 }
 0x43c   : > { %1880 = vmatmul.msk.f32.gmra.mxu2 %vm913_vm15, %v1338_v3  ;;  %1528 = vmatpush.msra.mxu1 %v1505_v51 }
 0x43e   : > { %1529 = vmatpush.msra.mxu1 %v1504_v52  ;;  %v2043_v52 = vld [vmem:[%s741_s30] ss:$0 sm:$0xff] }
 0x440   : > { %1530 = vmatpush.msra.mxu1 %v1503_v53 }
 0x442   : > { %1531 = vmatpush.msra.mxu1 %v1502_v54 }
 0x443   : > { %1873 = vmatmul.msk.f32.gmra.mxu1 %vm913_vm15, %v1213_v9  ;;  %vm1404_vm15 = vcmask 195584  }
 0x477   : > { %v994_v59 = vpop.f32.mrf.mxu2 }
 0x49e   : > { %v997_v12 = vpop.f32.mrf.mxu2 }
 0x4a6   : > { %v1119_v23 = vpop.f32.mrf.mxu2 }
 0x4a7   : > { %1377 = vrot.lane.b32.xlu2 %v1119_v23, %s2356_s24 }
 0x4af   : > { %v1122_v45 = vpop.f32.mrf.mxu2 }
 0x4b7   : > { %v1369_v14 = vpop.f32.mrf.mxu2 }
 0x4b8   : > { %1393 = vrot.lane.b32.xlu2 %v1369_v14, %s2357_s0  ;;  %v1244_v2 = vpop.f32.mrf.mxu1 }
 0x4b9   : > { %1385 = vrot.lane.b32.xlu0 %v1244_v2, %s2358_s8 }
 0x4bf   : > { %v1372_v15 = vpop.f32.mrf.mxu2 }
 0x4c0   : > { %1395 = vrot.lane.b32.xlu1 %v1372_v15, %s2357_s0  ;;  %v1247_v10 = vpop.f32.mrf.mxu1 }
 0x4c1   : > { %1379 = vrot.lane.b32.xlu0 %v1122_v45, %s2356_s24  ;;  %1387 = vrot.lane.b32.xlu2 %v1247_v10, %s2358_s8 }
 0x501   : > { %v1378_v22 = vpop.permute.xlu2 %1377 }
 0x502   : > { %v1399_v24 = vsel %vm879_vm13, %v994_v59, %v1378_v22  ;;  %v1563_v22 = vld [vmem:[%s2689_s7 + $0x30] sm:$0xff] }
 0x503   : > { %1585 = vmatpush.msra.mxu3 %v1563_v22 }
 0x512   : > { %v1394_v27 = vpop.permute.xlu2 %1393 }
 0x51b   : > { %v1388_v4 = vpop.permute.xlu2 %1387 }
 0x52b   : > { %v1386_v26 = vpop.permute.xlu0 %1385 }
 0x52c   : > { %v1402_v28 = vsel %vm1401_vm14, %v1399_v24, %v1386_v26  ;;  %v1562_v24 = vld [vmem:[%s2689_s7 + $0x28] sm:$0xff]  ;;  %v1561_v26 = vld [vmem:[%s2689_s7 + $0x20] sm:$0xff] }
 0x52d   : > { %v1405_v29 = vsel %vm1404_vm15, %v1402_v28, %v1394_v27  ;;  %1586 = vmatpush.msra.mxu3 %v1562_v24  ;;  %v1560_v27 = vld [vmem:[%s2689_s7 + $0x18] sm:$0xff]  ;;  %v1559_v28 = vld [vmem:[%s2689_s7 + $0x10] sm:$0xff] }
 0x52e   : > { %1881 = vmatmul.msk.f32.vlgmr.msra.gmra.mxu0 %vm777_vm4, %v1405_v29  ;;  %v1558_v29 = vld [vmem:[%s2689_s7 + $0x8] sm:$0xff] }
 0x52f   : > { %1587 = vmatpush.msra.mxu3 %v1561_v26 }
 0x531   : > { %1588 = vmatpush.msra.mxu3 %v1560_v27 }
 0x532   : > { %v1396_v32 = vpop.permute.xlu1 %1395 }
 0x533   : > { %v1380_v30 = vpop.permute.xlu0 %1379  ;;  %1589 = vmatpush.msra.mxu3 %v1559_v28 }
 0x534   : > { %v1400_v31 = vsel %vm879_vm13, %v997_v12, %v1380_v30  ;;  %v1557_v30 = vld [vmem:[%s2689_s7] sm:$0xff] }
 0x535   : > { %v1403_v33 = vsel %vm1401_vm14, %v1400_v31, %v1388_v4  ;;  %1590 = vmatpush.msra.mxu3 %v1558_v29  ;;  %v2042_v4 = vld [vmem:[%s733_s17] ss:$0 sm:$0xff] }
 0x536   : > { %v1406_v34 = vsel %vm1404_vm15, %v1403_v33, %v1396_v32 }
 0x537   : > { %1882 = vmatmul.msk.f32.gmra.mxu0 %vm777_vm4, %v1406_v34  ;;  %1591 = vmatpush.msra.mxu3 %v1557_v30 }
 0x5ab   : > { %v1438_v36 = vpop.f32.mrf.mxu0 }
 0x5ac   : > { %v1439_v37 = vadd.f32 %v2039_v35, %v1438_v36 }
 0x5ae   : > { %v2892_v38 = vadd.f32 %v1439_v37, %v2704_v11 }
 0x5b0   : > { %v1448_v0 = vsel %vm777_vm4, %v2892_v38, 0.0 }
 0x5b1   : > { %1449 = vadd.xlane.f32.xlu0 %v1448_v0 }
 0x5b4   : > { %v1441_v39 = vpop.f32.mrf.mxu0 }
 0x5b5   : > { %v1442_v40 = vadd.f32 %v2039_v35, %v1441_v39 }
 0x5b7   : > { %v2897_v41 = vadd.f32 %v1442_v40, %v2709_v13 }
 0x5b9   : > { %v1451_v42 = vsel %vm781_vm5, %v2897_v41, 0.0 }
 0x5ba   : > { %1452 = vadd.xlane.f32.xlu2 %v1451_v42 }
 0x624   : > { %v1450_v43 = vpop.xlane.xlu0 %1449 }
 0x625   : > { %v1454_v11 = vmul.f32 %v1450_v43, %v2713_v21 }
 0x627   : > { %v1456_v20 = vsub.f32 %v2892_v38, %v1454_v11 }
 0x629   : > { %v1458_v44 = vmul.f32 %v1456_v20, %v1456_v20 }
 0x62b   : > { %v1460_v46 = vsel %vm777_vm4, %v1458_v44, 0.0 }
 0x62c   : > { %1461 = vadd.xlane.f32.xlu1 %v1460_v46 }
 0x62d   : > { %v1453_v48 = vpop.xlane.xlu2 %1452 }
 0x62e   : > { %v1455_v13 = vmul.f32 %v1453_v48, %v2713_v21 }
 0x630   : > { %v1457_v49 = vsub.f32 %v2897_v41, %v1455_v13 }
 0x632   : > { %v1459_v47 = vmul.f32 %v1457_v49, %v1457_v49 }
 0x634   : > { %v1463_v50 = vsel %vm781_vm5, %v1459_v47, 0.0 }
 0x635   : > { %1464 = vadd.xlane.f32.xlu0 %v1463_v50 }
 0x69f   : > { %v1462_v55 = vpop.xlane.xlu1 %1461 }
 0x6a0   : > { %v1466_v56 = vmul.f32 %v1462_v55, %v2713_v21 }
 0x6a2   : > { %v1468_v57 = vadd.f32 1e-05, %v1466_v56 }
 0x6a4   : > { %2082 = vrsqrt.f32 %v1468_v57  ;;  %vm1476_vm0 = vweird.f32 %v1468_v57 }
 0x6a8   : > { %v1465_v58 = vpop.xlane.xlu0 %1464 }
 0x6a9   : > { %v1467_v1 = vmul.f32 %v1465_v58, %v2713_v21  ;;  %v2041_v21 = vld [vmem:[%s725_s1] ss:$0 sm:$0xff] }
 0x6aa   : > { %v2083_v60 = vpop.eup %2082 }
 0x6ab   : > { %v1471_v61 = vmul.f32 %v2083_v60, %v1468_v57  ;;  %v1469_v25 = vadd.f32 1e-05, %v1467_v1  ;;  %vm1477_vm13 = vweird.f32 %v2083_v60 }
 0x6ac   : > { %vm1478_vm1 = vmor %vm1476_vm0, %vm1477_vm13 }
 0x6ad   : > { %v1472_v62 = vmul.f32 %v2083_v60, %v1471_v61  ;;  %2084 = vrsqrt.f32 %v1469_v25  ;;  %vm1486_vm3 = vweird.f32 %v1469_v25 }
 0x6af   : > { %v1473_v63 = vmul.f32 0.5, %v1472_v62 }
 0x6b1   : > { %v1474_v3 = vsub.f32 1.5, %v1473_v63 }
 0x6b3   : > { %v2085_v5 = vpop.eup %2084  ;;  %v1475_v6 = vmul.f32 %v2083_v60, %v1474_v3 }
 0x6b4   : > { %v1481_v8 = vmul.f32 %v2085_v5, %v1469_v25  ;;  %vm1487_vm2 = vweird.f32 %v2085_v5 }
 0x6b5   : > { %v1479_v9 = vsel %vm1478_vm1, %v2083_v60, %v1475_v6  ;;  %vm1488_vm6 = vmor %vm1486_vm3, %vm1487_vm2 }
 0x6b6   : > { %v1490_v59 = vmul.f32 %v1479_v9, %v1456_v20  ;;  %v1482_v12 = vmul.f32 %v2085_v5, %v1481_v8 }
 0x6b8   : > { %v1495_v23 = vmul.f32 %v2040_v7, %v1490_v59  ;;  %v1483_v45 = vmul.f32 0.5, %v1482_v12 }
 0x6ba   : > { %v1484_v14 = vsub.f32 1.5, %v1483_v45  ;;  %v1500_v2 = vadd.f32 %v2041_v21, %v1495_v23 }
 0x6bc   : > { %v1485_v15 = vmul.f32 %v2085_v5, %v1484_v14  ;;  %1883 = vmatmul.msk.f32.vlgmr.msra.gmra.mxu1 %vm777_vm4, %v1500_v2 }
 0x6be   : > { %v1489_v10 = vsel %vm1488_vm6, %v2085_v5, %v1485_v15 }
 0x6bf   : > { %v1491_v16 = vmul.f32 %v1489_v10, %v1457_v49 }
 0x6c1   : > { %v1496_v17 = vmul.f32 %v2040_v7, %v1491_v16 }
 0x6c3   : > { %v1501_v18 = vadd.f32 %v2041_v21, %v1496_v17 }
 0x6c5   : > { %1884 = vmatmul.msk.f32.gmra.mxu1 %vm777_vm4, %v1501_v18 }
 0x739   : > { %v1533_v31 = vpop.f32.mrf.mxu1 }
 0x73a   : > { %v1534_v32 = vadd.f32 %v2042_v4, %v1533_v31 }
 0x73c   : > { %v1541_v33 = vmul.f32 0.044715, %v1534_v32  ;;  %v1539_v44 = vmul.f32 0.5, %v1534_v32 }
 0x73e   : > { %v1543_v34 = vmul.f32 %v1541_v33, %v1534_v32 }
 0x740   : > { %v1545_v35 = vmul.f32 %v1543_v34, %v1534_v32 }
 0x742   : > { %v1547_v36 = vadd.f32 %v1545_v35, %v1534_v32  ;;  %v1536_v37 = vpop.f32.mrf.mxu1 }
 0x743   : > { %v1537_v0 = vadd.f32 %v2042_v4, %v1536_v37 }
 0x744   : > { %v1549_v39 = vmul.f32 0.7978846, %v1547_v36 }
 0x745   : > { %v1542_v40 = vmul.f32 0.044715, %v1537_v0  ;;  %v1540_v47 = vmul.f32 0.5, %v1537_v0 }
 0x746   : > { %2086 = vtanh.f32 %v1549_v39 }
 0x747   : > { %v1544_v42 = vmul.f32 %v1542_v40, %v1537_v0 }
 0x749   : > { %v1546_v43 = vmul.f32 %v1544_v42, %v1537_v0 }
 0x74b   : > { %v1548_v11 = vadd.f32 %v1546_v43, %v1537_v0 }
 0x74c   : > { %v2087_v20 = vpop.eup %2086 }
 0x74d   : > { %v1553_v46 = vadd.f32 1.0, %v2087_v20  ;;  %v1550_v48 = vmul.f32 0.7978846, %v1548_v11 }
 0x74f   : > { %v1555_v13 = vmul.f32 %v1553_v46, %v1539_v44  ;;  %2088 = vtanh.f32 %v1550_v48 }
 0x751   : > { %1885 = vmatmul.msk.f32.vlgmr.msra.gmra.mxu3 %vm1569_vm7, %v1555_v13 }
 0x755   : > { %v2089_v49 = vpop.eup %2088 }
 0x756   : > { %v1554_v50 = vadd.f32 1.0, %v2089_v49 }
 0x758   : > { %v1556_v51 = vmul.f32 %v1554_v50, %v1540_v47 }
 0x75a   : > { %1886 = vmatmul.msk.f32.gmra.mxu3 %vm1569_vm7, %v1556_v51 }
 0x7d4   : > { %v1593_v53 = vpop.f32.mrf.mxu3 }
 0x7d5   : > { %v1594_v54 = vadd.f32 %v2043_v52, %v1593_v53 }
 0x7d7   : > { %v1599_v55 = vadd.f32 %v1594_v54, %v2892_v38 }
 0x7d9   : > { %1601 = vst.msk [vmem:[%s2694_s12] sm:$0xff] %vm777_vm4, %v1599_v55 }
 0x7dd   : > { %v1596_v56 = vpop.f32.mrf.mxu3 }
 0x7de   : > { %v1597_v57 = vadd.f32 %v2043_v52, %v1596_v56 }
 0x7e0   : > { %v1600_v58 = vadd.f32 %v1597_v57, %v2897_v41 }
 0x7e2   : > { %1602 = vst.msk [vmem:[%s2694_s12 + $0x8] sm:$0x1] %vm781_vm5, %v1600_v58 }
 0x7e3 PF: > { %s31_s23 = sadd.s32 1, %s2338_s23   ;;  %s3065_s29 = sld [smem:[#allocation13_spill]] }
 0x7e4   : > { %p28_p11 = scmp.ge.s32.totalorder %s31_s23, 6   ;;  %s3066_s30 = sld [smem:[#allocation14_spill]] }
 0x7e5   : > { %s3067_s15 = sld [smem:[#allocation21_spill]] }
 0x7e6   : > { %s3068_s16 = sld [smem:[#allocation15_spill]] }
 0x7e7   : > { %s3069_s17 = sld [smem:[#allocation16_spill]] }
 0x7e8   : > { %s3070_s18 = sld [smem:[#allocation23_spill]]  ;;  %30 = sbr.rel (!%p28_p11) target bundleno = 26 (0x1a), region = 179 }
 0x7e9   : > { %s3071_s19 = sld [smem:[#allocation18_spill]] }
 0x7ea   : > { %s3072_s20 = sld [smem:[#allocation19_spill]] }
 0x7eb   : > { %s3073_s21 = sld [smem:[#allocation20_spill]] }
 0x7ec   : > { %s3074_s22 = sld [smem:[#allocation22_spill]] }
 0x7ed   :  { %1624 = vsyncpa [#allocation3], 1 }
 0x7ee   :  { %1626 = vsyncpa [#allocation3 + $0x1], 1 }
 0x7ef   :  { %1627 = vsyncpa [#allocation5], 1 }
 0x7f0   :  { %1628 = vsyncpa [#allocation8], 1 }
 0x7f1   :  { %1630 = vsyncpa [#allocation8 + $0x1], 1 }

</bundles_post_ra>
